<compile_context>
chip_gen: v6e
topology: v6e:2x2x1
jax: 0.10.0
libtpu: 0.0.40
codegen_flags: <defaults>
</compile_context>

<pallas_src>
import functools

import jax
import jax.numpy as jnp
from jax.experimental import pallas as pl
from jax.experimental.pallas import tpu as pltpu


def _layernorm(x, gamma, beta, eps=1e-5):
    mu = jnp.mean(x, axis=-1, keepdims=True)
    var = jnp.mean((x - mu) ** 2, axis=-1, keepdims=True)
    return (x - mu) * jax.lax.rsqrt(var + eps) * gamma + beta


def _block_kernel(x_ref,
                  ln1g_ref, ln1b_ref,
                  wqkv_ref, wp_ref, bp_ref,
                  ln2g_ref, ln2b_ref,
                  w1_ref, b1_ref, w2_ref, b2_ref,
                  o_ref,
                  *, n_head):
    # x_ref block: (T, C)  (batch dim squeezed away by the BlockSpec)
    x = x_ref[...].astype(jnp.float32)                     # (T, C) f32
    T, C = x.shape
    hs = C // n_head

    # ---- LayerNorm 1 (f32) ----
    h = _layernorm(x, ln1g_ref[0], ln1b_ref[0])

    # ---- Fused full-width QKV projection: (T,C) @ (C,3C), bf16 MXU / f32 acc ----
    # (1/sqrt(hs) is already folded into the Q columns of wqkv on the host.)
    qkv = jnp.dot(h.astype(jnp.bfloat16), wqkv_ref[...],
                  preferred_element_type=jnp.float32)       # (T, 3C) f32
    qkv = qkv.astype(jnp.bfloat16)
    q = qkv[:, :C]
    k = qkv[:, C:2 * C]
    v = qkv[:, 2 * C:]

    # Causal mask built once (large finite negative: padding-safe, no NaN rows).
    rows = jax.lax.broadcasted_iota(jnp.int32, (T, T), 0)
    cols = jax.lax.broadcasted_iota(jnp.int32, (T, T), 1)
    causal = rows >= cols

    # ---- Per-head scores / softmax / PV (intrinsically (T,hs)-shaped matmuls) ----
    head_outs = []
    for hd in range(n_head):
        sl = slice(hd * hs, (hd + 1) * hs)
        qh, kh, vh = q[:, sl], k[:, sl], v[:, sl]
        s = jnp.einsum('qd,kd->qk', qh, kh,
                       preferred_element_type=jnp.float32)   # (T, T) f32
        s = jnp.where(causal, s, jnp.float32(-1e30))          # scores stay f32
        m = jnp.max(s, axis=-1, keepdims=True)
        e = jnp.exp(s - m)
        l = jnp.sum(e, axis=-1, keepdims=True)
        p = (e * pl.reciprocal(l, approx=True)).astype(jnp.bfloat16)
        head_outs.append(jnp.dot(p, vh, preferred_element_type=jnp.float32))

    # Explicit head-merge -> single full-K output projection (T,C)@(C,C).
    o = jnp.concatenate(head_outs, axis=-1).astype(jnp.bfloat16)   # (T, C) bf16
    att = jnp.dot(o, wp_ref[...], preferred_element_type=jnp.float32) + bp_ref[0]

    x1 = x + att                                                    # residual 1 (f32)

    # ---- LayerNorm 2 + FeedForward (bf16 MXU operands, f32 accumulation) ----
    h2 = _layernorm(x1, ln2g_ref[0], ln2b_ref[0])
    f = jnp.dot(h2.astype(jnp.bfloat16), w1_ref[...],
                preferred_element_type=jnp.float32) + b1_ref[0]
    f = jnp.maximum(f, 0.0)                                         # ReLU
    f = jnp.dot(f.astype(jnp.bfloat16), w2_ref[...],
                preferred_element_type=jnp.float32) + b2_ref[0]

    o_ref[...] = (x1 + f).astype(o_ref.dtype)                       # residual 2


def _pick_vmem_limit():
    """Generation-dependent VMEM budget: headroom on 64-MiB parts, more on 128-MiB."""
    cap = None
    try:
        cap = int(pltpu.get_tpu_info().vmem_capacity_bytes)
    except Exception:
        try:
            kind = jax.devices()[0].device_kind.lower()
            cap = 64 * 1024 * 1024 if "v7" in kind else 128 * 1024 * 1024
        except Exception:
            cap = 128 * 1024 * 1024
    if cap <= 64 * 1024 * 1024:
        return 48 * 1024 * 1024          # v7x-class: leave scratch/semaphore headroom
    return 100 * 1024 * 1024             # v5e / v6e: use more of the 128 MiB


def _make_call(B, T, C, n_head, out_dtype, use_buffered):
    H = 4 * C

    def const(shape):
        kw = {}
        if use_buffered:
            # Constant index_map -> single buffer is enough; halves weight residency.
            kw["pipeline_mode"] = pl.Buffered(1)
        return pl.BlockSpec(shape, lambda b: (0,) * len(shape), **kw)

    kernel = functools.partial(_block_kernel, n_head=n_head)
    return pl.pallas_call(
        kernel,
        out_shape=jax.ShapeDtypeStruct((B, T, C), out_dtype),
        grid_spec=pltpu.PrefetchScalarGridSpec(
            num_scalar_prefetch=0,
            grid=(B,),
            in_specs=[
                # None == pl.Squeezed(): leading batch dim dropped from the kernel view.
                pl.BlockSpec((None, T, C), lambda b: (b, 0, 0)),   # x
                const((1, C)), const((1, C)),                      # ln1 gamma/beta (f32)
                const((C, 3 * C)),                                 # fused Wqkv (bf16)
                const((C, C)),                                     # Wproj (bf16)
                const((1, C)),                                     # bproj (f32)
                const((1, C)), const((1, C)),                      # ln2 gamma/beta
                const((C, H)), const((1, H)),                      # W1 (bf16), b1 (f32)
                const((H, C)), const((1, C)),                      # W2 (bf16), b2 (f32)
            ],
            out_specs=pl.BlockSpec((None, T, C), lambda b: (b, 0, 0)),
        ),
        compiler_params=pltpu.CompilerParams(
            dimension_semantics=("parallel",),
            vmem_limit_bytes=_pick_vmem_limit(),
        ),
    )


def prepare_params(params, n_head):
    """One-time (model-load) host-side weight relayout + bf16 cast.

    Folds the 1/sqrt(head_size) softmax scale into the Q columns of the fused QKV
    weight so no per-step scaling is needed in-kernel.
    """
    C = params["wq"].shape[0]
    hs = C // n_head
    scale = float(hs) ** -0.5
    bf16 = jnp.bfloat16
    w_qkv = jnp.concatenate(
        [params["wq"] * scale, params["wk"], params["wv"]], axis=1).astype(bf16)
    return {
        "ln1_g": params["ln1_g"], "ln1_b": params["ln1_b"],
        "w_qkv": w_qkv,
        "wp": params["wp"].astype(bf16),
        "bp": params["bp"],
        "ln2_g": params["ln2_g"], "ln2_b": params["ln2_b"],
        "w1": params["w1"].astype(bf16), "b1": params["b1"],
        "w2": params["w2"].astype(bf16), "b2": params["b2"],
    }


def block_forward(x, prepped, n_head):
    """x: (B, T, C) float32. `prepped` comes from prepare_params()."""
    B, T, C = x.shape
    args = (x,
            prepped["ln1_g"], prepped["ln1_b"],
            prepped["w_qkv"], prepped["wp"], prepped["bp"],
            prepped["ln2_g"], prepped["ln2_b"],
            prepped["w1"], prepped["b1"], prepped["w2"], prepped["b2"])
    try:
        return _make_call(B, T, C, n_head, x.dtype, use_buffered=True)(*args)
    except Exception:
        # Compatibility guard: if this JAX build rejects pl.Buffered(1) on the
        # constant-weight BlockSpecs, fall back to default double-buffering.
        return _make_call(B, T, C, n_head, x.dtype, use_buffered=False)(*args)


def _reference(x, params, n_head):
    """Pure-JAX f32 reference mirroring the PyTorch module (dropout = identity)."""
    B, T, C = x.shape
    hs = C // n_head
    h = _layernorm(x, params["ln1_g"][0], params["ln1_b"][0])
    q = h @ params["wq"]
    k = h @ params["wk"]
    v = h @ params["wv"]
    causal = jnp.tril(jnp.ones((T, T), bool))
    outs = []
    for hd in range(n_head):
        qs, ks, vs = (a[..., hd * hs:(hd + 1) * hs] for a in (q, k, v))
        wei = (qs @ jnp.swapaxes(ks, -2, -1)) * (hs ** -0.5)
        wei = jnp.where(causal, wei, -jnp.inf)
        wei = jax.nn.softmax(wei, axis=-1)
        outs.append(wei @ vs)
    att = jnp.concatenate(outs, axis=-1) @ params["wp"] + params["bp"][0]
    x1 = x + att
    h2 = _layernorm(x1, params["ln2_g"][0], params["ln2_b"][0])
    f = jnp.maximum(h2 @ params["w1"] + params["b1"][0], 0.0)
    f = f @ params["w2"] + params["b2"][0]
    return x1 + f


def init_params(key, C):
    H = 4 * C
    ks = jax.random.split(key, 10)
    s = lambda fan_in: fan_in ** -0.5
    return {
        "ln1_g": jnp.ones((1, C), jnp.float32),
        "ln1_b": jnp.zeros((1, C), jnp.float32),
        # per-head K/Q/V projections stacked along the output dim -> (C, C), (in, out)
        "wq": jax.random.normal(ks[0], (C, C), jnp.float32) * s(C),
        "wk": jax.random.normal(ks[1], (C, C), jnp.float32) * s(C),
        "wv": jax.random.normal(ks[2], (C, C), jnp.float32) * s(C),
        "wp": jax.random.normal(ks[3], (C, C), jnp.float32) * s(C),
        "bp": jax.random.normal(ks[4], (1, C), jnp.float32) * 0.5,
        "ln2_g": jnp.ones((1, C), jnp.float32),
        "ln2_b": jnp.zeros((1, C), jnp.float32),
        "w1": jax.random.normal(ks[5], (C, H), jnp.float32) * s(C),
        "b1": jax.random.normal(ks[6], (1, H), jnp.float32) * 0.5,
        "w2": jax.random.normal(ks[7], (H, C), jnp.float32) * s(H),
        "b2": jax.random.normal(ks[8], (1, C), jnp.float32) * 0.5,
    }


if __name__ == "__main__":
    B, T, C, n_head = 2, 8, 32, 4   # block_size == T == 8, dropout = 0.0
    key = jax.random.PRNGKey(0)
    kx, kp = jax.random.split(key)
    x = jax.random.normal(kx, (B, T, C), jnp.float32)
    params = init_params(kp, C)

    prepped = prepare_params(params, n_head)   # one-time host-side relayout / cast

    out = block_forward(x, prepped, n_head)
    out = jax.block_until_ready(out)

    ref = _reference(x, params, n_head)
    assert out.shape == (B, T, C)
    # Kernel uses bf16 MXU operands with f32 accumulation + approx reciprocal in the
    # softmax -> small deviation from the pure-f32 reference is expected; tolerance is
    # well above that but far below any structural error (wrong mask / layout / missing
    # residual or bias).
    err = float(jnp.max(jnp.abs(out - ref)))
    assert err < 1e-1, f"max abs error vs f32 reference: {err}"
    print("KERNEL_OK")
</pallas_src>

<mosaic_0001>
module attributes {stable_mosaic.version = 11 : i64} {
  func.func @_block_kernel(%arg0: i32, %arg1: memref<1x8x32xf32, #tpu.memory_space<vmem>>, %arg2: memref<1x32xf32, #tpu.memory_space<vmem>>, %arg3: memref<1x32xf32, #tpu.memory_space<vmem>>, %arg4: memref<32x96xbf16, #tpu.memory_space<vmem>>, %arg5: memref<32x32xbf16, #tpu.memory_space<vmem>>, %arg6: memref<1x32xf32, #tpu.memory_space<vmem>>, %arg7: memref<1x32xf32, #tpu.memory_space<vmem>>, %arg8: memref<1x32xf32, #tpu.memory_space<vmem>>, %arg9: memref<32x128xbf16, #tpu.memory_space<vmem>>, %arg10: memref<1x128xf32, #tpu.memory_space<vmem>>, %arg11: memref<128x32xbf16, #tpu.memory_space<vmem>>, %arg12: memref<1x32xf32, #tpu.memory_space<vmem>>, %arg13: memref<1x8x32xf32, #tpu.memory_space<vmem>>) attributes {dimension_semantics = [#tpu.dimension_semantics<parallel>], iteration_bounds = array<i64: 2>, scalar_prefetch = 0 : i64, scratch_operands = 0 : i64, tpu.core_type = #tpu.core_type<tc>, window_params = [{transform_indices = @transform_0, window_bounds = array<i64: 1, 8, 32>}, {pipeline_mode = #tpu.pipeline_mode<synchronous>, transform_indices = @transform_1, window_bounds = array<i64: 1, 32>}, {pipeline_mode = #tpu.pipeline_mode<synchronous>, transform_indices = @transform_2, window_bounds = array<i64: 1, 32>}, {pipeline_mode = #tpu.pipeline_mode<synchronous>, transform_indices = @transform_3, window_bounds = array<i64: 32, 96>}, {pipeline_mode = #tpu.pipeline_mode<synchronous>, transform_indices = @transform_4, window_bounds = array<i64: 32, 32>}, {pipeline_mode = #tpu.pipeline_mode<synchronous>, transform_indices = @transform_5, window_bounds = array<i64: 1, 32>}, {pipeline_mode = #tpu.pipeline_mode<synchronous>, transform_indices = @transform_6, window_bounds = array<i64: 1, 32>}, {pipeline_mode = #tpu.pipeline_mode<synchronous>, transform_indices = @transform_7, window_bounds = array<i64: 1, 32>}, {pipeline_mode = #tpu.pipeline_mode<synchronous>, transform_indices = @transform_8, window_bounds = array<i64: 32, 128>}, {pipeline_mode = #tpu.pipeline_mode<synchronous>, transform_indices = @transform_9, window_bounds = array<i64: 1, 128>}, {pipeline_mode = #tpu.pipeline_mode<synchronous>, transform_indices = @transform_10, window_bounds = array<i64: 128, 32>}, {pipeline_mode = #tpu.pipeline_mode<synchronous>, transform_indices = @transform_11, window_bounds = array<i64: 1, 32>}, {transform_indices = @transform_12, window_bounds = array<i64: 1, 8, 32>}]} {
    %c0 = arith.constant 0 : index
    %c0_0 = arith.constant 0 : index
    %c0_1 = arith.constant 0 : index
    %0 = vector.load %arg1[%c0, %c0_0, %c0_1] : memref<1x8x32xf32, #tpu.memory_space<vmem>>, vector<1x8x32xf32>
    %1 = vector.shape_cast %0 : vector<1x8x32xf32> to vector<8x32xf32>
    %c0_2 = arith.constant 0 : index
    %c0_3 = arith.constant 0 : index
    %2 = vector.load %arg2[%c0_2, %c0_3] : memref<1x32xf32, #tpu.memory_space<vmem>>, vector<1x32xf32>
    %3 = vector.shape_cast %2 : vector<1x32xf32> to vector<32xf32>
    %c0_4 = arith.constant 0 : index
    %c0_5 = arith.constant 0 : index
    %4 = vector.load %arg3[%c0_4, %c0_5] : memref<1x32xf32, #tpu.memory_space<vmem>>, vector<1x32xf32>
    %5 = vector.shape_cast %4 : vector<1x32xf32> to vector<32xf32>
    %cst = arith.constant dense<0.000000e+00> : vector<8xf32>
    %6 = vector.multi_reduction <add>, %1, %cst [1] : vector<8x32xf32> to vector<8xf32>
    %7 = vector.shape_cast %6 : vector<8xf32> to vector<8x1xf32>
    %cst_6 = arith.constant 3.200000e+01 : f32
    %8 = vector.broadcast %cst_6 : f32 to vector<8x1xf32>
    %9 = arith.divf %7, %8 : vector<8x1xf32>
    %10 = vector.broadcast %9 : vector<8x1xf32> to vector<8x32xf32>
    %11 = arith.subf %1, %10 : vector<8x32xf32>
    %12 = arith.mulf %11, %11 : vector<8x32xf32>
    %cst_7 = arith.constant dense<0.000000e+00> : vector<8xf32>
    %13 = vector.multi_reduction <add>, %12, %cst_7 [1] : vector<8x32xf32> to vector<8xf32>
    %14 = vector.shape_cast %13 : vector<8xf32> to vector<8x1xf32>
    %cst_8 = arith.constant 3.200000e+01 : f32
    %15 = vector.broadcast %cst_8 : f32 to vector<8x1xf32>
    %16 = arith.divf %14, %15 : vector<8x1xf32>
    %17 = vector.broadcast %9 : vector<8x1xf32> to vector<8x32xf32>
    %18 = arith.subf %1, %17 : vector<8x32xf32>
    %cst_9 = arith.constant 9.99999974E-6 : f32
    %19 = vector.broadcast %cst_9 : f32 to vector<8x1xf32>
    %20 = arith.addf %16, %19 : vector<8x1xf32>
    %21 = math.rsqrt %20 : vector<8x1xf32>
    %22 = vector.broadcast %21 : vector<8x1xf32> to vector<8x32xf32>
    %23 = arith.mulf %18, %22 : vector<8x32xf32>
    %24 = vector.shape_cast %3 : vector<32xf32> to vector<1x32xf32>
    %25 = vector.broadcast %24 : vector<1x32xf32> to vector<8x32xf32>
    %26 = arith.mulf %23, %25 : vector<8x32xf32>
    %27 = vector.shape_cast %5 : vector<32xf32> to vector<1x32xf32>
    %28 = vector.broadcast %27 : vector<1x32xf32> to vector<8x32xf32>
    %29 = arith.addf %26, %28 : vector<8x32xf32>
    %30 = arith.truncf %29 : vector<8x32xf32> to vector<8x32xbf16>
    %c0_10 = arith.constant 0 : index
    %c0_11 = arith.constant 0 : index
    %31 = vector.load %arg4[%c0_10, %c0_11] : memref<32x96xbf16, #tpu.memory_space<vmem>>, vector<32x96xbf16>
    %cst_12 = arith.constant dense<0.000000e+00> : vector<8x96xf32>
    %32 = tpu.matmul %30, %31, %cst_12 {dimension_numbers = #tpu.dot_dimension_numbers<[1], [0], [0], [1], [0, 0, 1, 1], [], []>} : vector<8x32xbf16>, vector<32x96xbf16>, vector<8x96xf32> -> vector<8x96xf32>
    %33 = arith.truncf %32 : vector<8x96xf32> to vector<8x96xbf16>
    %34 = vector.extract_strided_slice %33 {offsets = [0, 0], sizes = [8, 32], strides = [1, 1]} : vector<8x96xbf16> to vector<8x32xbf16>
    %35 = vector.extract_strided_slice %33 {offsets = [0, 32], sizes = [8, 32], strides = [1, 1]} : vector<8x96xbf16> to vector<8x32xbf16>
    %36 = vector.extract_strided_slice %33 {offsets = [0, 64], sizes = [8, 32], strides = [1, 1]} : vector<8x96xbf16> to vector<8x32xbf16>
    %37 = tpu.iota {dimensions = array<i32: 0>} : vector<8x8xi32>
    %38 = tpu.iota {dimensions = array<i32: 1>} : vector<8x8xi32>
    %39 = arith.cmpi sge, %37, %38 : vector<8x8xi32>
    %40 = vector.extract_strided_slice %34 {offsets = [0, 0], sizes = [8, 8], strides = [1, 1]} : vector<8x32xbf16> to vector<8x8xbf16>
    %41 = vector.extract_strided_slice %35 {offsets = [0, 0], sizes = [8, 8], strides = [1, 1]} : vector<8x32xbf16> to vector<8x8xbf16>
    %42 = vector.extract_strided_slice %36 {offsets = [0, 0], sizes = [8, 8], strides = [1, 1]} : vector<8x32xbf16> to vector<8x8xbf16>
    "tpu.trace_start"() <{level = 10 : i32, message = "qd,kd->qk"}> : () -> ()
    %cst_13 = arith.constant dense<0.000000e+00> : vector<8x8xf32>
    %43 = tpu.matmul %40, %41, %cst_13 {dimension_numbers = #tpu.dot_dimension_numbers<[1], [1], [0], [0], [0, 0, 1, 0], [], []>} : vector<8x8xbf16>, vector<8x8xbf16>, vector<8x8xf32> -> vector<8x8xf32>
    %cst_14 = arith.constant -1.000000e+30 : f32
    "tpu.trace_stop"() : () -> ()
    %44 = vector.broadcast %cst_14 : f32 to vector<8x8xf32>
    %45 = arith.select %39, %43, %44 : vector<8x8xi1>, vector<8x8xf32>
    %cst_15 = arith.constant dense<0xFF800000> : vector<8xf32>
    %46 = vector.multi_reduction <maximumf>, %45, %cst_15 [1] : vector<8x8xf32> to vector<8xf32>
    %47 = vector.shape_cast %46 : vector<8xf32> to vector<8x1xf32>
    %48 = vector.broadcast %47 : vector<8x1xf32> to vector<8x8xf32>
    %49 = arith.subf %45, %48 : vector<8x8xf32>
    %50 = math.exp %49 : vector<8x8xf32>
    %cst_16 = arith.constant dense<0.000000e+00> : vector<8xf32>
    %51 = vector.multi_reduction <add>, %50, %cst_16 [1] : vector<8x8xf32> to vector<8xf32>
    %52 = vector.shape_cast %51 : vector<8xf32> to vector<8x1xf32>
    %53 = tpu.reciprocal %52 {approx = true} : vector<8x1xf32> -> vector<8x1xf32>
    %54 = vector.broadcast %53 : vector<8x1xf32> to vector<8x8xf32>
    %55 = arith.mulf %50, %54 : vector<8x8xf32>
    %56 = arith.truncf %55 : vector<8x8xf32> to vector<8x8xbf16>
    %cst_17 = arith.constant dense<0.000000e+00> : vector<8x8xf32>
    %57 = tpu.matmul %56, %42, %cst_17 {dimension_numbers = #tpu.dot_dimension_numbers<[1], [0], [0], [1], [0, 0, 1, 1], [], []>} : vector<8x8xbf16>, vector<8x8xbf16>, vector<8x8xf32> -> vector<8x8xf32>
    %58 = vector.extract_strided_slice %34 {offsets = [0, 8], sizes = [8, 8], strides = [1, 1]} : vector<8x32xbf16> to vector<8x8xbf16>
    %59 = vector.extract_strided_slice %35 {offsets = [0, 8], sizes = [8, 8], strides = [1, 1]} : vector<8x32xbf16> to vector<8x8xbf16>
    %60 = vector.extract_strided_slice %36 {offsets = [0, 8], sizes = [8, 8], strides = [1, 1]} : vector<8x32xbf16> to vector<8x8xbf16>
    "tpu.trace_start"() <{level = 10 : i32, message = "qd,kd->qk"}> : () -> ()
    %cst_18 = arith.constant dense<0.000000e+00> : vector<8x8xf32>
    %61 = tpu.matmul %58, %59, %cst_18 {dimension_numbers = #tpu.dot_dimension_numbers<[1], [1], [0], [0], [0, 0, 1, 0], [], []>} : vector<8x8xbf16>, vector<8x8xbf16>, vector<8x8xf32> -> vector<8x8xf32>
    %cst_19 = arith.constant -1.000000e+30 : f32
    "tpu.trace_stop"() : () -> ()
    %62 = vector.broadcast %cst_19 : f32 to vector<8x8xf32>
    %63 = arith.select %39, %61, %62 : vector<8x8xi1>, vector<8x8xf32>
    %cst_20 = arith.constant dense<0xFF800000> : vector<8xf32>
    %64 = vector.multi_reduction <maximumf>, %63, %cst_20 [1] : vector<8x8xf32> to vector<8xf32>
    %65 = vector.shape_cast %64 : vector<8xf32> to vector<8x1xf32>
    %66 = vector.broadcast %65 : vector<8x1xf32> to vector<8x8xf32>
    %67 = arith.subf %63, %66 : vector<8x8xf32>
    %68 = math.exp %67 : vector<8x8xf32>
    %cst_21 = arith.constant dense<0.000000e+00> : vector<8xf32>
    %69 = vector.multi_reduction <add>, %68, %cst_21 [1] : vector<8x8xf32> to vector<8xf32>
    %70 = vector.shape_cast %69 : vector<8xf32> to vector<8x1xf32>
    %71 = tpu.reciprocal %70 {approx = true} : vector<8x1xf32> -> vector<8x1xf32>
    %72 = vector.broadcast %71 : vector<8x1xf32> to vector<8x8xf32>
    %73 = arith.mulf %68, %72 : vector<8x8xf32>
    %74 = arith.truncf %73 : vector<8x8xf32> to vector<8x8xbf16>
    %cst_22 = arith.constant dense<0.000000e+00> : vector<8x8xf32>
    %75 = tpu.matmul %74, %60, %cst_22 {dimension_numbers = #tpu.dot_dimension_numbers<[1], [0], [0], [1], [0, 0, 1, 1], [], []>} : vector<8x8xbf16>, vector<8x8xbf16>, vector<8x8xf32> -> vector<8x8xf32>
    %76 = vector.extract_strided_slice %34 {offsets = [0, 16], sizes = [8, 8], strides = [1, 1]} : vector<8x32xbf16> to vector<8x8xbf16>
    %77 = vector.extract_strided_slice %35 {offsets = [0, 16], sizes = [8, 8], strides = [1, 1]} : vector<8x32xbf16> to vector<8x8xbf16>
    %78 = vector.extract_strided_slice %36 {offsets = [0, 16], sizes = [8, 8], strides = [1, 1]} : vector<8x32xbf16> to vector<8x8xbf16>
    "tpu.trace_start"() <{level = 10 : i32, message = "qd,kd->qk"}> : () -> ()
    %cst_23 = arith.constant dense<0.000000e+00> : vector<8x8xf32>
    %79 = tpu.matmul %76, %77, %cst_23 {dimension_numbers = #tpu.dot_dimension_numbers<[1], [1], [0], [0], [0, 0, 1, 0], [], []>} : vector<8x8xbf16>, vector<8x8xbf16>, vector<8x8xf32> -> vector<8x8xf32>
    %cst_24 = arith.constant -1.000000e+30 : f32
    "tpu.trace_stop"() : () -> ()
    %80 = vector.broadcast %cst_24 : f32 to vector<8x8xf32>
    %81 = arith.select %39, %79, %80 : vector<8x8xi1>, vector<8x8xf32>
    %cst_25 = arith.constant dense<0xFF800000> : vector<8xf32>
    %82 = vector.multi_reduction <maximumf>, %81, %cst_25 [1] : vector<8x8xf32> to vector<8xf32>
    %83 = vector.shape_cast %82 : vector<8xf32> to vector<8x1xf32>
    %84 = vector.broadcast %83 : vector<8x1xf32> to vector<8x8xf32>
    %85 = arith.subf %81, %84 : vector<8x8xf32>
    %86 = math.exp %85 : vector<8x8xf32>
    %cst_26 = arith.constant dense<0.000000e+00> : vector<8xf32>
    %87 = vector.multi_reduction <add>, %86, %cst_26 [1] : vector<8x8xf32> to vector<8xf32>
    %88 = vector.shape_cast %87 : vector<8xf32> to vector<8x1xf32>
    %89 = tpu.reciprocal %88 {approx = true} : vector<8x1xf32> -> vector<8x1xf32>
    %90 = vector.broadcast %89 : vector<8x1xf32> to vector<8x8xf32>
    %91 = arith.mulf %86, %90 : vector<8x8xf32>
    %92 = arith.truncf %91 : vector<8x8xf32> to vector<8x8xbf16>
    %cst_27 = arith.constant dense<0.000000e+00> : vector<8x8xf32>
    %93 = tpu.matmul %92, %78, %cst_27 {dimension_numbers = #tpu.dot_dimension_numbers<[1], [0], [0], [1], [0, 0, 1, 1], [], []>} : vector<8x8xbf16>, vector<8x8xbf16>, vector<8x8xf32> -> vector<8x8xf32>
    %94 = vector.extract_strided_slice %34 {offsets = [0, 24], sizes = [8, 8], strides = [1, 1]} : vector<8x32xbf16> to vector<8x8xbf16>
    %95 = vector.extract_strided_slice %35 {offsets = [0, 24], sizes = [8, 8], strides = [1, 1]} : vector<8x32xbf16> to vector<8x8xbf16>
    %96 = vector.extract_strided_slice %36 {offsets = [0, 24], sizes = [8, 8], strides = [1, 1]} : vector<8x32xbf16> to vector<8x8xbf16>
    "tpu.trace_start"() <{level = 10 : i32, message = "qd,kd->qk"}> : () -> ()
    %cst_28 = arith.constant dense<0.000000e+00> : vector<8x8xf32>
    %97 = tpu.matmul %94, %95, %cst_28 {dimension_numbers = #tpu.dot_dimension_numbers<[1], [1], [0], [0], [0, 0, 1, 0], [], []>} : vector<8x8xbf16>, vector<8x8xbf16>, vector<8x8xf32> -> vector<8x8xf32>
    %cst_29 = arith.constant -1.000000e+30 : f32
    "tpu.trace_stop"() : () -> ()
    %98 = vector.broadcast %cst_29 : f32 to vector<8x8xf32>
    %99 = arith.select %39, %97, %98 : vector<8x8xi1>, vector<8x8xf32>
    %cst_30 = arith.constant dense<0xFF800000> : vector<8xf32>
    %100 = vector.multi_reduction <maximumf>, %99, %cst_30 [1] : vector<8x8xf32> to vector<8xf32>
    %101 = vector.shape_cast %100 : vector<8xf32> to vector<8x1xf32>
    %102 = vector.broadcast %101 : vector<8x1xf32> to vector<8x8xf32>
    %103 = arith.subf %99, %102 : vector<8x8xf32>
    %104 = math.exp %103 : vector<8x8xf32>
    %cst_31 = arith.constant dense<0.000000e+00> : vector<8xf32>
    %105 = vector.multi_reduction <add>, %104, %cst_31 [1] : vector<8x8xf32> to vector<8xf32>
    %106 = vector.shape_cast %105 : vector<8xf32> to vector<8x1xf32>
    %107 = tpu.reciprocal %106 {approx = true} : vector<8x1xf32> -> vector<8x1xf32>
    %108 = vector.broadcast %107 : vector<8x1xf32> to vector<8x8xf32>
    %109 = arith.mulf %104, %108 : vector<8x8xf32>
    %110 = arith.truncf %109 : vector<8x8xf32> to vector<8x8xbf16>
    %cst_32 = arith.constant dense<0.000000e+00> : vector<8x8xf32>
    %111 = tpu.matmul %110, %96, %cst_32 {dimension_numbers = #tpu.dot_dimension_numbers<[1], [0], [0], [1], [0, 0, 1, 1], [], []>} : vector<8x8xbf16>, vector<8x8xbf16>, vector<8x8xf32> -> vector<8x8xf32>
    %112 = tpu.concatenate %57, %75, %93, %111 in 1 : vector<8x8xf32>, vector<8x8xf32>, vector<8x8xf32>, vector<8x8xf32> -> vector<8x32xf32>
    %113 = arith.truncf %112 : vector<8x32xf32> to vector<8x32xbf16>
    %c0_33 = arith.constant 0 : index
    %c0_34 = arith.constant 0 : index
    %114 = vector.load %arg5[%c0_33, %c0_34] : memref<32x32xbf16, #tpu.memory_space<vmem>>, vector<32x32xbf16>
    %cst_35 = arith.constant dense<0.000000e+00> : vector<8x32xf32>
    %115 = tpu.matmul %113, %114, %cst_35 {dimension_numbers = #tpu.dot_dimension_numbers<[1], [0], [0], [1], [0, 0, 1, 1], [], []>} : vector<8x32xbf16>, vector<32x32xbf16>, vector<8x32xf32> -> vector<8x32xf32>
    %c0_36 = arith.constant 0 : index
    %c0_37 = arith.constant 0 : index
    %116 = vector.load %arg6[%c0_36, %c0_37] : memref<1x32xf32, #tpu.memory_space<vmem>>, vector<1x32xf32>
    %117 = vector.shape_cast %116 : vector<1x32xf32> to vector<32xf32>
    %118 = vector.shape_cast %117 : vector<32xf32> to vector<1x32xf32>
    %119 = vector.broadcast %118 : vector<1x32xf32> to vector<8x32xf32>
    %120 = arith.addf %115, %119 : vector<8x32xf32>
    %121 = arith.addf %1, %120 : vector<8x32xf32>
    %c0_38 = arith.constant 0 : index
    %c0_39 = arith.constant 0 : index
    %122 = vector.load %arg7[%c0_38, %c0_39] : memref<1x32xf32, #tpu.memory_space<vmem>>, vector<1x32xf32>
    %123 = vector.shape_cast %122 : vector<1x32xf32> to vector<32xf32>
    %c0_40 = arith.constant 0 : index
    %c0_41 = arith.constant 0 : index
    %124 = vector.load %arg8[%c0_40, %c0_41] : memref<1x32xf32, #tpu.memory_space<vmem>>, vector<1x32xf32>
    %125 = vector.shape_cast %124 : vector<1x32xf32> to vector<32xf32>
    %cst_42 = arith.constant dense<0.000000e+00> : vector<8xf32>
    %126 = vector.multi_reduction <add>, %121, %cst_42 [1] : vector<8x32xf32> to vector<8xf32>
    %127 = vector.shape_cast %126 : vector<8xf32> to vector<8x1xf32>
    %cst_43 = arith.constant 3.200000e+01 : f32
    %128 = vector.broadcast %cst_43 : f32 to vector<8x1xf32>
    %129 = arith.divf %127, %128 : vector<8x1xf32>
    %130 = vector.broadcast %129 : vector<8x1xf32> to vector<8x32xf32>
    %131 = arith.subf %121, %130 : vector<8x32xf32>
    %132 = arith.mulf %131, %131 : vector<8x32xf32>
    %cst_44 = arith.constant dense<0.000000e+00> : vector<8xf32>
    %133 = vector.multi_reduction <add>, %132, %cst_44 [1] : vector<8x32xf32> to vector<8xf32>
    %134 = vector.shape_cast %133 : vector<8xf32> to vector<8x1xf32>
    %cst_45 = arith.constant 3.200000e+01 : f32
    %135 = vector.broadcast %cst_45 : f32 to vector<8x1xf32>
    %136 = arith.divf %134, %135 : vector<8x1xf32>
    %137 = vector.broadcast %129 : vector<8x1xf32> to vector<8x32xf32>
    %138 = arith.subf %121, %137 : vector<8x32xf32>
    %cst_46 = arith.constant 9.99999974E-6 : f32
    %139 = vector.broadcast %cst_46 : f32 to vector<8x1xf32>
    %140 = arith.addf %136, %139 : vector<8x1xf32>
    %141 = math.rsqrt %140 : vector<8x1xf32>
    %142 = vector.broadcast %141 : vector<8x1xf32> to vector<8x32xf32>
    %143 = arith.mulf %138, %142 : vector<8x32xf32>
    %144 = vector.shape_cast %123 : vector<32xf32> to vector<1x32xf32>
    %145 = vector.broadcast %144 : vector<1x32xf32> to vector<8x32xf32>
    %146 = arith.mulf %143, %145 : vector<8x32xf32>
    %147 = vector.shape_cast %125 : vector<32xf32> to vector<1x32xf32>
    %148 = vector.broadcast %147 : vector<1x32xf32> to vector<8x32xf32>
    %149 = arith.addf %146, %148 : vector<8x32xf32>
    %150 = arith.truncf %149 : vector<8x32xf32> to vector<8x32xbf16>
    %c0_47 = arith.constant 0 : index
    %c0_48 = arith.constant 0 : index
    %151 = vector.load %arg9[%c0_47, %c0_48] : memref<32x128xbf16, #tpu.memory_space<vmem>>, vector<32x128xbf16>
    %cst_49 = arith.constant dense<0.000000e+00> : vector<8x128xf32>
    %152 = tpu.matmul %150, %151, %cst_49 {dimension_numbers = #tpu.dot_dimension_numbers<[1], [0], [0], [1], [0, 0, 1, 1], [], []>} : vector<8x32xbf16>, vector<32x128xbf16>, vector<8x128xf32> -> vector<8x128xf32>
    %c0_50 = arith.constant 0 : index
    %c0_51 = arith.constant 0 : index
    %153 = vector.load %arg10[%c0_50, %c0_51] : memref<1x128xf32, #tpu.memory_space<vmem>>, vector<1x128xf32>
    %154 = vector.shape_cast %153 : vector<1x128xf32> to vector<128xf32>
    %155 = vector.shape_cast %154 : vector<128xf32> to vector<1x128xf32>
    %156 = vector.broadcast %155 : vector<1x128xf32> to vector<8x128xf32>
    %157 = arith.addf %152, %156 : vector<8x128xf32>
    %cst_52 = arith.constant 0.000000e+00 : f32
    %158 = vector.broadcast %cst_52 : f32 to vector<8x128xf32>
    %159 = arith.maximumf %157, %158 : vector<8x128xf32>
    %160 = arith.truncf %159 : vector<8x128xf32> to vector<8x128xbf16>
    %c0_53 = arith.constant 0 : index
    %c0_54 = arith.constant 0 : index
    %161 = vector.load %arg11[%c0_53, %c0_54] : memref<128x32xbf16, #tpu.memory_space<vmem>>, vector<128x32xbf16>
    %cst_55 = arith.constant dense<0.000000e+00> : vector<8x32xf32>
    %162 = tpu.matmul %160, %161, %cst_55 {dimension_numbers = #tpu.dot_dimension_numbers<[1], [0], [0], [1], [0, 0, 1, 1], [], []>} : vector<8x128xbf16>, vector<128x32xbf16>, vector<8x32xf32> -> vector<8x32xf32>
    %c0_56 = arith.constant 0 : index
    %c0_57 = arith.constant 0 : index
    %163 = vector.load %arg12[%c0_56, %c0_57] : memref<1x32xf32, #tpu.memory_space<vmem>>, vector<1x32xf32>
    %164 = vector.shape_cast %163 : vector<1x32xf32> to vector<32xf32>
    %165 = vector.shape_cast %164 : vector<32xf32> to vector<1x32xf32>
    %166 = vector.broadcast %165 : vector<1x32xf32> to vector<8x32xf32>
    %167 = arith.addf %162, %166 : vector<8x32xf32>
    %168 = arith.addf %121, %167 : vector<8x32xf32>
    %c0_58 = arith.constant 0 : index
    %c0_59 = arith.constant 0 : index
    %c0_60 = arith.constant 0 : index
    %169 = vector.load %arg13[%c0_58, %c0_59, %c0_60] : memref<1x8x32xf32, #tpu.memory_space<vmem>>, vector<1x8x32xf32>
    %170 = vector.shape_cast %169 : vector<1x8x32xf32> to vector<8x32xf32>
    %171 = vector.shape_cast %168 : vector<8x32xf32> to vector<1x8x32xf32>
    tpu.vector_store %arg13[%c0_58, %c0_59, %c0_60], %171 {strides = array<i32>} : memref<1x8x32xf32, #tpu.memory_space<vmem>>, vector<1x8x32xf32>,
    return
  }
  func.func @transform_0(%arg0: i32) -> (i32, i32, i32) {
    %c0_i32 = arith.constant 0 : i32
    %c0_i32_0 = arith.constant 0 : i32
    %c0_i32_1 = arith.constant 0 : i32
    return %arg0, %c0_i32, %c0_i32_0 : i32, i32, i32
  }
  func.func @transform_1(%arg0: i32) -> (i32, i32) {
    %c0_i32 = arith.constant 0 : i32
    %c0_i32_0 = arith.constant 0 : i32
    %c0_i32_1 = arith.constant 0 : i32
    return %c0_i32, %c0_i32_0 : i32, i32
  }
  func.func @transform_2(%arg0: i32) -> (i32, i32) {
    %c0_i32 = arith.constant 0 : i32
    %c0_i32_0 = arith.constant 0 : i32
    %c0_i32_1 = arith.constant 0 : i32
    return %c0_i32, %c0_i32_0 : i32, i32
  }
  func.func @transform_3(%arg0: i32) -> (i32, i32) {
    %c0_i32 = arith.constant 0 : i32
    %c0_i32_0 = arith.constant 0 : i32
    %c0_i32_1 = arith.constant 0 : i32
    return %c0_i32, %c0_i32_0 : i32, i32
  }
  func.func @transform_4(%arg0: i32) -> (i32, i32) {
    %c0_i32 = arith.constant 0 : i32
    %c0_i32_0 = arith.constant 0 : i32
    %c0_i32_1 = arith.constant 0 : i32
    return %c0_i32, %c0_i32_0 : i32, i32
  }
  func.func @transform_5(%arg0: i32) -> (i32, i32) {
    %c0_i32 = arith.constant 0 : i32
    %c0_i32_0 = arith.constant 0 : i32
    %c0_i32_1 = arith.constant 0 : i32
    return %c0_i32, %c0_i32_0 : i32, i32
  }
  func.func @transform_6(%arg0: i32) -> (i32, i32) {
    %c0_i32 = arith.constant 0 : i32
    %c0_i32_0 = arith.constant 0 : i32
    %c0_i32_1 = arith.constant 0 : i32
    return %c0_i32, %c0_i32_0 : i32, i32
  }
  func.func @transform_7(%arg0: i32) -> (i32, i32) {
    %c0_i32 = arith.constant 0 : i32
    %c0_i32_0 = arith.constant 0 : i32
    %c0_i32_1 = arith.constant 0 : i32
    return %c0_i32, %c0_i32_0 : i32, i32
  }
  func.func @transform_8(%arg0: i32) -> (i32, i32) {
    %c0_i32 = arith.constant 0 : i32
    %c0_i32_0 = arith.constant 0 : i32
    %c0_i32_1 = arith.constant 0 : i32
    return %c0_i32, %c0_i32_0 : i32, i32
  }
  func.func @transform_9(%arg0: i32) -> (i32, i32) {
    %c0_i32 = arith.constant 0 : i32
    %c0_i32_0 = arith.constant 0 : i32
    %c0_i32_1 = arith.constant 0 : i32
    return %c0_i32, %c0_i32_0 : i32, i32
  }
  func.func @transform_10(%arg0: i32) -> (i32, i32) {
    %c0_i32 = arith.constant 0 : i32
    %c0_i32_0 = arith.constant 0 : i32
    %c0_i32_1 = arith.constant 0 : i32
    return %c0_i32, %c0_i32_0 : i32, i32
  }
  func.func @transform_11(%arg0: i32) -> (i32, i32) {
    %c0_i32 = arith.constant 0 : i32
    %c0_i32_0 = arith.constant 0 : i32
    %c0_i32_1 = arith.constant 0 : i32
    return %c0_i32, %c0_i32_0 : i32, i32
  }
  func.func @transform_12(%arg0: i32) -> (i32, i32, i32) {
    %c0_i32 = arith.constant 0 : i32
    %c0_i32_0 = arith.constant 0 : i32
    %c0_i32_1 = arith.constant 0 : i32
    return %arg0, %c0_i32, %c0_i32_0 : i32, i32, i32
  }
}

module attributes {stable_mosaic.version = 11 : i64} {
  func.func @_block_kernel(%arg0: i32, %arg1: memref<1x8x32xf32, #tpu.memory_space<vmem>>, %arg2: memref<1x32xf32, #tpu.memory_space<vmem>>, %arg3: memref<1x32xf32, #tpu.memory_space<vmem>>, %arg4: memref<32x96xbf16, #tpu.memory_space<vmem>>, %arg5: memref<32x32xbf16, #tpu.memory_space<vmem>>, %arg6: memref<1x32xf32, #tpu.memory_space<vmem>>, %arg7: memref<1x32xf32, #tpu.memory_space<vmem>>, %arg8: memref<1x32xf32, #tpu.memory_space<vmem>>, %arg9: memref<32x128xbf16, #tpu.memory_space<vmem>>, %arg10: memref<1x128xf32, #tpu.memory_space<vmem>>, %arg11: memref<128x32xbf16, #tpu.memory_space<vmem>>, %arg12: memref<1x32xf32, #tpu.memory_space<vmem>>, %arg13: memref<1x8x32xf32, #tpu.memory_space<vmem>>) attributes {dimension_semantics = [#tpu.dimension_semantics<parallel>], iteration_bounds = array<i64: 2>, scalar_prefetch = 0 : i64, scratch_operands = 0 : i64, tpu.core_type = #tpu.core_type<tc>, window_params = [{transform_indices = @transform_0, window_bounds = array<i64: 1, 8, 32>}, {pipeline_mode = #tpu.pipeline_mode<synchronous>, transform_indices = @transform_1, window_bounds = array<i64: 1, 32>}, {pipeline_mode = #tpu.pipeline_mode<synchronous>, transform_indices = @transform_2, window_bounds = array<i64: 1, 32>}, {pipeline_mode = #tpu.pipeline_mode<synchronous>, transform_indices = @transform_3, window_bounds = array<i64: 32, 96>}, {pipeline_mode = #tpu.pipeline_mode<synchronous>, transform_indices = @transform_4, window_bounds = array<i64: 32, 32>}, {pipeline_mode = #tpu.pipeline_mode<synchronous>, transform_indices = @transform_5, window_bounds = array<i64: 1, 32>}, {pipeline_mode = #tpu.pipeline_mode<synchronous>, transform_indices = @transform_6, window_bounds = array<i64: 1, 32>}, {pipeline_mode = #tpu.pipeline_mode<synchronous>, transform_indices = @transform_7, window_bounds = array<i64: 1, 32>}, {pipeline_mode = #tpu.pipeline_mode<synchronous>, transform_indices = @transform_8, window_bounds = array<i64: 32, 128>}, {pipeline_mode = #tpu.pipeline_mode<synchronous>, transform_indices = @transform_9, window_bounds = array<i64: 1, 128>}, {pipeline_mode = #tpu.pipeline_mode<synchronous>, transform_indices = @transform_10, window_bounds = array<i64: 128, 32>}, {pipeline_mode = #tpu.pipeline_mode<synchronous>, transform_indices = @transform_11, window_bounds = array<i64: 1, 32>}, {transform_indices = @transform_12, window_bounds = array<i64: 1, 8, 32>}]} {
    %c0 = arith.constant 0 : index
    %c0_0 = arith.constant 0 : index
    %c0_1 = arith.constant 0 : index
    %0 = vector.load %arg1[%c0, %c0_0, %c0_1] : memref<1x8x32xf32, #tpu.memory_space<vmem>>, vector<1x8x32xf32>
    %1 = vector.shape_cast %0 : vector<1x8x32xf32> to vector<8x32xf32>
    %c0_2 = arith.constant 0 : index
    %c0_3 = arith.constant 0 : index
    %2 = vector.load %arg2[%c0_2, %c0_3] : memref<1x32xf32, #tpu.memory_space<vmem>>, vector<1x32xf32>
    %3 = vector.shape_cast %2 : vector<1x32xf32> to vector<32xf32>
    %c0_4 = arith.constant 0 : index
    %c0_5 = arith.constant 0 : index
    %4 = vector.load %arg3[%c0_4, %c0_5] : memref<1x32xf32, #tpu.memory_space<vmem>>, vector<1x32xf32>
    %5 = vector.shape_cast %4 : vector<1x32xf32> to vector<32xf32>
    %cst = arith.constant dense<0.000000e+00> : vector<8xf32>
    %6 = vector.multi_reduction <add>, %1, %cst [1] : vector<8x32xf32> to vector<8xf32>
    %7 = vector.shape_cast %6 : vector<8xf32> to vector<8x1xf32>
    %cst_6 = arith.constant 3.200000e+01 : f32
    %8 = vector.broadcast %cst_6 : f32 to vector<8x1xf32>
    %9 = arith.divf %7, %8 : vector<8x1xf32>
    %10 = vector.broadcast %9 : vector<8x1xf32> to vector<8x32xf32>
    %11 = arith.subf %1, %10 : vector<8x32xf32>
    %12 = arith.mulf %11, %11 : vector<8x32xf32>
    %cst_7 = arith.constant dense<0.000000e+00> : vector<8xf32>
    %13 = vector.multi_reduction <add>, %12, %cst_7 [1] : vector<8x32xf32> to vector<8xf32>
    %14 = vector.shape_cast %13 : vector<8xf32> to vector<8x1xf32>
    %cst_8 = arith.constant 3.200000e+01 : f32
    %15 = vector.broadcast %cst_8 : f32 to vector<8x1xf32>
    %16 = arith.divf %14, %15 : vector<8x1xf32>
    %17 = vector.broadcast %9 : vector<8x1xf32> to vector<8x32xf32>
    %18 = arith.subf %1, %17 : vector<8x32xf32>
    %cst_9 = arith.constant 9.99999974E-6 : f32
    %19 = vector.broadcast %cst_9 : f32 to vector<8x1xf32>
    %20 = arith.addf %16, %19 : vector<8x1xf32>
    %21 = math.rsqrt %20 : vector<8x1xf32>
    %22 = vector.broadcast %21 : vector<8x1xf32> to vector<8x32xf32>
    %23 = arith.mulf %18, %22 : vector<8x32xf32>
    %24 = vector.shape_cast %3 : vector<32xf32> to vector<1x32xf32>
    %25 = vector.broadcast %24 : vector<1x32xf32> to vector<8x32xf32>
    %26 = arith.mulf %23, %25 : vector<8x32xf32>
    %27 = vector.shape_cast %5 : vector<32xf32> to vector<1x32xf32>
    %28 = vector.broadcast %27 : vector<1x32xf32> to vector<8x32xf32>
    %29 = arith.addf %26, %28 : vector<8x32xf32>
    %30 = arith.truncf %29 : vector<8x32xf32> to vector<8x32xbf16>
    %c0_10 = arith.constant 0 : index
    %c0_11 = arith.constant 0 : index
    %31 = vector.load %arg4[%c0_10, %c0_11] : memref<32x96xbf16, #tpu.memory_space<vmem>>, vector<32x96xbf16>
    %cst_12 = arith.constant dense<0.000000e+00> : vector<8x96xf32>
    %32 = tpu.matmul %30, %31, %cst_12 {dimension_numbers = #tpu.dot_dimension_numbers<[1], [0], [0], [1], [0, 0, 1, 1], [], []>} : vector<8x32xbf16>, vector<32x96xbf16>, vector<8x96xf32> -> vector<8x96xf32>
    %33 = arith.truncf %32 : vector<8x96xf32> to vector<8x96xbf16>
    %34 = vector.extract_strided_slice %33 {offsets = [0, 0], sizes = [8, 32], strides = [1, 1]} : vector<8x96xbf16> to vector<8x32xbf16>
    %35 = vector.extract_strided_slice %33 {offsets = [0, 32], sizes = [8, 32], strides = [1, 1]} : vector<8x96xbf16> to vector<8x32xbf16>
    %36 = vector.extract_strided_slice %33 {offsets = [0, 64], sizes = [8, 32], strides = [1, 1]} : vector<8x96xbf16> to vector<8x32xbf16>
    %37 = tpu.iota {dimensions = array<i32: 0>} : vector<8x8xi32>
    %38 = tpu.iota {dimensions = array<i32: 1>} : vector<8x8xi32>
    %39 = arith.cmpi sge, %37, %38 : vector<8x8xi32>
    %40 = vector.extract_strided_slice %34 {offsets = [0, 0], sizes = [8, 8], strides = [1, 1]} : vector<8x32xbf16> to vector<8x8xbf16>
    %41 = vector.extract_strided_slice %35 {offsets = [0, 0], sizes = [8, 8], strides = [1, 1]} : vector<8x32xbf16> to vector<8x8xbf16>
    %42 = vector.extract_strided_slice %36 {offsets = [0, 0], sizes = [8, 8], strides = [1, 1]} : vector<8x32xbf16> to vector<8x8xbf16>
    "tpu.trace_start"() <{level = 10 : i32, message = "qd,kd->qk"}> : () -> ()
    %cst_13 = arith.constant dense<0.000000e+00> : vector<8x8xf32>
    %43 = tpu.matmul %40, %41, %cst_13 {dimension_numbers = #tpu.dot_dimension_numbers<[1], [1], [0], [0], [0, 0, 1, 0], [], []>} : vector<8x8xbf16>, vector<8x8xbf16>, vector<8x8xf32> -> vector<8x8xf32>
    %cst_14 = arith.constant -1.000000e+30 : f32
    "tpu.trace_stop"() : () -> ()
    %44 = vector.broadcast %cst_14 : f32 to vector<8x8xf32>
    %45 = arith.select %39, %43, %44 : vector<8x8xi1>, vector<8x8xf32>
    %cst_15 = arith.constant dense<0xFF800000> : vector<8xf32>
    %46 = vector.multi_reduction <maximumf>, %45, %cst_15 [1] : vector<8x8xf32> to vector<8xf32>
    %47 = vector.shape_cast %46 : vector<8xf32> to vector<8x1xf32>
    %48 = vector.broadcast %47 : vector<8x1xf32> to vector<8x8xf32>
    %49 = arith.subf %45, %48 : vector<8x8xf32>
    %50 = math.exp %49 : vector<8x8xf32>
    %cst_16 = arith.constant dense<0.000000e+00> : vector<8xf32>
    %51 = vector.multi_reduction <add>, %50, %cst_16 [1] : vector<8x8xf32> to vector<8xf32>
    %52 = vector.shape_cast %51 : vector<8xf32> to vector<8x1xf32>
    %53 = tpu.reciprocal %52 {approx = true} : vector<8x1xf32> -> vector<8x1xf32>
    %54 = vector.broadcast %53 : vector<8x1xf32> to vector<8x8xf32>
    %55 = arith.mulf %50, %54 : vector<8x8xf32>
    %56 = arith.truncf %55 : vector<8x8xf32> to vector<8x8xbf16>
    %cst_17 = arith.constant dense<0.000000e+00> : vector<8x8xf32>
    %57 = tpu.matmul %56, %42, %cst_17 {dimension_numbers = #tpu.dot_dimension_numbers<[1], [0], [0], [1], [0, 0, 1, 1], [], []>} : vector<8x8xbf16>, vector<8x8xbf16>, vector<8x8xf32> -> vector<8x8xf32>
    %58 = vector.extract_strided_slice %34 {offsets = [0, 8], sizes = [8, 8], strides = [1, 1]} : vector<8x32xbf16> to vector<8x8xbf16>
    %59 = vector.extract_strided_slice %35 {offsets = [0, 8], sizes = [8, 8], strides = [1, 1]} : vector<8x32xbf16> to vector<8x8xbf16>
    %60 = vector.extract_strided_slice %36 {offsets = [0, 8], sizes = [8, 8], strides = [1, 1]} : vector<8x32xbf16> to vector<8x8xbf16>
    "tpu.trace_start"() <{level = 10 : i32, message = "qd,kd->qk"}> : () -> ()
    %cst_18 = arith.constant dense<0.000000e+00> : vector<8x8xf32>
    %61 = tpu.matmul %58, %59, %cst_18 {dimension_numbers = #tpu.dot_dimension_numbers<[1], [1], [0], [0], [0, 0, 1, 0], [], []>} : vector<8x8xbf16>, vector<8x8xbf16>, vector<8x8xf32> -> vector<8x8xf32>
    %cst_19 = arith.constant -1.000000e+30 : f32
    "tpu.trace_stop"() : () -> ()
    %62 = vector.broadcast %cst_19 : f32 to vector<8x8xf32>
    %63 = arith.select %39, %61, %62 : vector<8x8xi1>, vector<8x8xf32>
    %cst_20 = arith.constant dense<0xFF800000> : vector<8xf32>
    %64 = vector.multi_reduction <maximumf>, %63, %cst_20 [1] : vector<8x8xf32> to vector<8xf32>
    %65 = vector.shape_cast %64 : vector<8xf32> to vector<8x1xf32>
    %66 = vector.broadcast %65 : vector<8x1xf32> to vector<8x8xf32>
    %67 = arith.subf %63, %66 : vector<8x8xf32>
    %68 = math.exp %67 : vector<8x8xf32>
    %cst_21 = arith.constant dense<0.000000e+00> : vector<8xf32>
    %69 = vector.multi_reduction <add>, %68, %cst_21 [1] : vector<8x8xf32> to vector<8xf32>
    %70 = vector.shape_cast %69 : vector<8xf32> to vector<8x1xf32>
    %71 = tpu.reciprocal %70 {approx = true} : vector<8x1xf32> -> vector<8x1xf32>
    %72 = vector.broadcast %71 : vector<8x1xf32> to vector<8x8xf32>
    %73 = arith.mulf %68, %72 : vector<8x8xf32>
    %74 = arith.truncf %73 : vector<8x8xf32> to vector<8x8xbf16>
    %cst_22 = arith.constant dense<0.000000e+00> : vector<8x8xf32>
    %75 = tpu.matmul %74, %60, %cst_22 {dimension_numbers = #tpu.dot_dimension_numbers<[1], [0], [0], [1], [0, 0, 1, 1], [], []>} : vector<8x8xbf16>, vector<8x8xbf16>, vector<8x8xf32> -> vector<8x8xf32>
    %76 = vector.extract_strided_slice %34 {offsets = [0, 16], sizes = [8, 8], strides = [1, 1]} : vector<8x32xbf16> to vector<8x8xbf16>
    %77 = vector.extract_strided_slice %35 {offsets = [0, 16], sizes = [8, 8], strides = [1, 1]} : vector<8x32xbf16> to vector<8x8xbf16>
    %78 = vector.extract_strided_slice %36 {offsets = [0, 16], sizes = [8, 8], strides = [1, 1]} : vector<8x32xbf16> to vector<8x8xbf16>
    "tpu.trace_start"() <{level = 10 : i32, message = "qd,kd->qk"}> : () -> ()
    %cst_23 = arith.constant dense<0.000000e+00> : vector<8x8xf32>
    %79 = tpu.matmul %76, %77, %cst_23 {dimension_numbers = #tpu.dot_dimension_numbers<[1], [1], [0], [0], [0, 0, 1, 0], [], []>} : vector<8x8xbf16>, vector<8x8xbf16>, vector<8x8xf32> -> vector<8x8xf32>
    %cst_24 = arith.constant -1.000000e+30 : f32
    "tpu.trace_stop"() : () -> ()
    %80 = vector.broadcast %cst_24 : f32 to vector<8x8xf32>
    %81 = arith.select %39, %79, %80 : vector<8x8xi1>, vector<8x8xf32>
    %cst_25 = arith.constant dense<0xFF800000> : vector<8xf32>
    %82 = vector.multi_reduction <maximumf>, %81, %cst_25 [1] : vector<8x8xf32> to vector<8xf32>
    %83 = vector.shape_cast %82 : vector<8xf32> to vector<8x1xf32>
    %84 = vector.broadcast %83 : vector<8x1xf32> to vector<8x8xf32>
    %85 = arith.subf %81, %84 : vector<8x8xf32>
    %86 = math.exp %85 : vector<8x8xf32>
    %cst_26 = arith.constant dense<0.000000e+00> : vector<8xf32>
    %87 = vector.multi_reduction <add>, %86, %cst_26 [1] : vector<8x8xf32> to vector<8xf32>
    %88 = vector.shape_cast %87 : vector<8xf32> to vector<8x1xf32>
    %89 = tpu.reciprocal %88 {approx = true} : vector<8x1xf32> -> vector<8x1xf32>
    %90 = vector.broadcast %89 : vector<8x1xf32> to vector<8x8xf32>
    %91 = arith.mulf %86, %90 : vector<8x8xf32>
    %92 = arith.truncf %91 : vector<8x8xf32> to vector<8x8xbf16>
    %cst_27 = arith.constant dense<0.000000e+00> : vector<8x8xf32>
    %93 = tpu.matmul %92, %78, %cst_27 {dimension_numbers = #tpu.dot_dimension_numbers<[1], [0], [0], [1], [0, 0, 1, 1], [], []>} : vector<8x8xbf16>, vector<8x8xbf16>, vector<8x8xf32> -> vector<8x8xf32>
    %94 = vector.extract_strided_slice %34 {offsets = [0, 24], sizes = [8, 8], strides = [1, 1]} : vector<8x32xbf16> to vector<8x8xbf16>
    %95 = vector.extract_strided_slice %35 {offsets = [0, 24], sizes = [8, 8], strides = [1, 1]} : vector<8x32xbf16> to vector<8x8xbf16>
    %96 = vector.extract_strided_slice %36 {offsets = [0, 24], sizes = [8, 8], strides = [1, 1]} : vector<8x32xbf16> to vector<8x8xbf16>
    "tpu.trace_start"() <{level = 10 : i32, message = "qd,kd->qk"}> : () -> ()
    %cst_28 = arith.constant dense<0.000000e+00> : vector<8x8xf32>
    %97 = tpu.matmul %94, %95, %cst_28 {dimension_numbers = #tpu.dot_dimension_numbers<[1], [1], [0], [0], [0, 0, 1, 0], [], []>} : vector<8x8xbf16>, vector<8x8xbf16>, vector<8x8xf32> -> vector<8x8xf32>
    %cst_29 = arith.constant -1.000000e+30 : f32
    "tpu.trace_stop"() : () -> ()
    %98 = vector.broadcast %cst_29 : f32 to vector<8x8xf32>
    %99 = arith.select %39, %97, %98 : vector<8x8xi1>, vector<8x8xf32>
    %cst_30 = arith.constant dense<0xFF800000> : vector<8xf32>
    %100 = vector.multi_reduction <maximumf>, %99, %cst_30 [1] : vector<8x8xf32> to vector<8xf32>
    %101 = vector.shape_cast %100 : vector<8xf32> to vector<8x1xf32>
    %102 = vector.broadcast %101 : vector<8x1xf32> to vector<8x8xf32>
    %103 = arith.subf %99, %102 : vector<8x8xf32>
    %104 = math.exp %103 : vector<8x8xf32>
    %cst_31 = arith.constant dense<0.000000e+00> : vector<8xf32>
    %105 = vector.multi_reduction <add>, %104, %cst_31 [1] : vector<8x8xf32> to vector<8xf32>
    %106 = vector.shape_cast %105 : vector<8xf32> to vector<8x1xf32>
    %107 = tpu.reciprocal %106 {approx = true} : vector<8x1xf32> -> vector<8x1xf32>
    %108 = vector.broadcast %107 : vector<8x1xf32> to vector<8x8xf32>
    %109 = arith.mulf %104, %108 : vector<8x8xf32>
    %110 = arith.truncf %109 : vector<8x8xf32> to vector<8x8xbf16>
    %cst_32 = arith.constant dense<0.000000e+00> : vector<8x8xf32>
    %111 = tpu.matmul %110, %96, %cst_32 {dimension_numbers = #tpu.dot_dimension_numbers<[1], [0], [0], [1], [0, 0, 1, 1], [], []>} : vector<8x8xbf16>, vector<8x8xbf16>, vector<8x8xf32> -> vector<8x8xf32>
    %112 = tpu.concatenate %57, %75, %93, %111 in 1 : vector<8x8xf32>, vector<8x8xf32>, vector<8x8xf32>, vector<8x8xf32> -> vector<8x32xf32>
    %113 = arith.truncf %112 : vector<8x32xf32> to vector<8x32xbf16>
    %c0_33 = arith.constant 0 : index
    %c0_34 = arith.constant 0 : index
    %114 = vector.load %arg5[%c0_33, %c0_34] : memref<32x32xbf16, #tpu.memory_space<vmem>>, vector<32x32xbf16>
    %cst_35 = arith.constant dense<0.000000e+00> : vector<8x32xf32>
    %115 = tpu.matmul %113, %114, %cst_35 {dimension_numbers = #tpu.dot_dimension_numbers<[1], [0], [0], [1], [0, 0, 1, 1], [], []>} : vector<8x32xbf16>, vector<32x32xbf16>, vector<8x32xf32> -> vector<8x32xf32>
    %c0_36 = arith.constant 0 : index
    %c0_37 = arith.constant 0 : index
    %116 = vector.load %arg6[%c0_36, %c0_37] : memref<1x32xf32, #tpu.memory_space<vmem>>, vector<1x32xf32>
    %117 = vector.shape_cast %116 : vector<1x32xf32> to vector<32xf32>
    %118 = vector.shape_cast %117 : vector<32xf32> to vector<1x32xf32>
    %119 = vector.broadcast %118 : vector<1x32xf32> to vector<8x32xf32>
    %120 = arith.addf %115, %119 : vector<8x32xf32>
    %121 = arith.addf %1, %120 : vector<8x32xf32>
    %c0_38 = arith.constant 0 : index
    %c0_39 = arith.constant 0 : index
    %122 = vector.load %arg7[%c0_38, %c0_39] : memref<1x32xf32, #tpu.memory_space<vmem>>, vector<1x32xf32>
    %123 = vector.shape_cast %122 : vector<1x32xf32> to vector<32xf32>
    %c0_40 = arith.constant 0 : index
    %c0_41 = arith.constant 0 : index
    %124 = vector.load %arg8[%c0_40, %c0_41] : memref<1x32xf32, #tpu.memory_space<vmem>>, vector<1x32xf32>
    %125 = vector.shape_cast %124 : vector<1x32xf32> to vector<32xf32>
    %cst_42 = arith.constant dense<0.000000e+00> : vector<8xf32>
    %126 = vector.multi_reduction <add>, %121, %cst_42 [1] : vector<8x32xf32> to vector<8xf32>
    %127 = vector.shape_cast %126 : vector<8xf32> to vector<8x1xf32>
    %cst_43 = arith.constant 3.200000e+01 : f32
    %128 = vector.broadcast %cst_43 : f32 to vector<8x1xf32>
    %129 = arith.divf %127, %128 : vector<8x1xf32>
    %130 = vector.broadcast %129 : vector<8x1xf32> to vector<8x32xf32>
    %131 = arith.subf %121, %130 : vector<8x32xf32>
    %132 = arith.mulf %131, %131 : vector<8x32xf32>
    %cst_44 = arith.constant dense<0.000000e+00> : vector<8xf32>
    %133 = vector.multi_reduction <add>, %132, %cst_44 [1] : vector<8x32xf32> to vector<8xf32>
    %134 = vector.shape_cast %133 : vector<8xf32> to vector<8x1xf32>
    %cst_45 = arith.constant 3.200000e+01 : f32
    %135 = vector.broadcast %cst_45 : f32 to vector<8x1xf32>
    %136 = arith.divf %134, %135 : vector<8x1xf32>
    %137 = vector.broadcast %129 : vector<8x1xf32> to vector<8x32xf32>
    %138 = arith.subf %121, %137 : vector<8x32xf32>
    %cst_46 = arith.constant 9.99999974E-6 : f32
    %139 = vector.broadcast %cst_46 : f32 to vector<8x1xf32>
    %140 = arith.addf %136, %139 : vector<8x1xf32>
    %141 = math.rsqrt %140 : vector<8x1xf32>
    %142 = vector.broadcast %141 : vector<8x1xf32> to vector<8x32xf32>
    %143 = arith.mulf %138, %142 : vector<8x32xf32>
    %144 = vector.shape_cast %123 : vector<32xf32> to vector<1x32xf32>
    %145 = vector.broadcast %144 : vector<1x32xf32> to vector<8x32xf32>
    %146 = arith.mulf %143, %145 : vector<8x32xf32>
    %147 = vector.shape_cast %125 : vector<32xf32> to vector<1x32xf32>
    %148 = vector.broadcast %147 : vector<1x32xf32> to vector<8x32xf32>
    %149 = arith.addf %146, %148 : vector<8x32xf32>
    %150 = arith.truncf %149 : vector<8x32xf32> to vector<8x32xbf16>
    %c0_47 = arith.constant 0 : index
    %c0_48 = arith.constant 0 : index
    %151 = vector.load %arg9[%c0_47, %c0_48] : memref<32x128xbf16, #tpu.memory_space<vmem>>, vector<32x128xbf16>
    %cst_49 = arith.constant dense<0.000000e+00> : vector<8x128xf32>
    %152 = tpu.matmul %150, %151, %cst_49 {dimension_numbers = #tpu.dot_dimension_numbers<[1], [0], [0], [1], [0, 0, 1, 1], [], []>} : vector<8x32xbf16>, vector<32x128xbf16>, vector<8x128xf32> -> vector<8x128xf32>
    %c0_50 = arith.constant 0 : index
    %c0_51 = arith.constant 0 : index
    %153 = vector.load %arg10[%c0_50, %c0_51] : memref<1x128xf32, #tpu.memory_space<vmem>>, vector<1x128xf32>
    %154 = vector.shape_cast %153 : vector<1x128xf32> to vector<128xf32>
    %155 = vector.shape_cast %154 : vector<128xf32> to vector<1x128xf32>
    %156 = vector.broadcast %155 : vector<1x128xf32> to vector<8x128xf32>
    %157 = arith.addf %152, %156 : vector<8x128xf32>
    %cst_52 = arith.constant 0.000000e+00 : f32
    %158 = vector.broadcast %cst_52 : f32 to vector<8x128xf32>
    %159 = arith.maximumf %157, %158 : vector<8x128xf32>
    %160 = arith.truncf %159 : vector<8x128xf32> to vector<8x128xbf16>
    %c0_53 = arith.constant 0 : index
    %c0_54 = arith.constant 0 : index
    %161 = vector.load %arg11[%c0_53, %c0_54] : memref<128x32xbf16, #tpu.memory_space<vmem>>, vector<128x32xbf16>
    %cst_55 = arith.constant dense<0.000000e+00> : vector<8x32xf32>
    %162 = tpu.matmul %160, %161, %cst_55 {dimension_numbers = #tpu.dot_dimension_numbers<[1], [0], [0], [1], [0, 0, 1, 1], [], []>} : vector<8x128xbf16>, vector<128x32xbf16>, vector<8x32xf32> -> vector<8x32xf32>
    %c0_56 = arith.constant 0 : index
    %c0_57 = arith.constant 0 : index
    %163 = vector.load %arg12[%c0_56, %c0_57] : memref<1x32xf32, #tpu.memory_space<vmem>>, vector<1x32xf32>
    %164 = vector.shape_cast %163 : vector<1x32xf32> to vector<32xf32>
    %165 = vector.shape_cast %164 : vector<32xf32> to vector<1x32xf32>
    %166 = vector.broadcast %165 : vector<1x32xf32> to vector<8x32xf32>
    %167 = arith.addf %162, %166 : vector<8x32xf32>
    %168 = arith.addf %121, %167 : vector<8x32xf32>
    %c0_58 = arith.constant 0 : index
    %c0_59 = arith.constant 0 : index
    %c0_60 = arith.constant 0 : index
    %169 = vector.load %arg13[%c0_58, %c0_59, %c0_60] : memref<1x8x32xf32, #tpu.memory_space<vmem>>, vector<1x8x32xf32>
    %170 = vector.shape_cast %169 : vector<1x8x32xf32> to vector<8x32xf32>
    %171 = vector.shape_cast %168 : vector<8x32xf32> to vector<1x8x32xf32>
    tpu.vector_store %arg13[%c0_58, %c0_59, %c0_60], %171 {strides = array<i32>} : memref<1x8x32xf32, #tpu.memory_space<vmem>>, vector<1x8x32xf32>,
    return
  }
  func.func @transform_0(%arg0: i32) -> (i32, i32, i32) {
    %c0_i32 = arith.constant 0 : i32
    %c0_i32_0 = arith.constant 0 : i32
    %c0_i32_1 = arith.constant 0 : i32
    return %arg0, %c0_i32, %c0_i32_0 : i32, i32, i32
  }
  func.func @transform_1(%arg0: i32) -> (i32, i32) {
    %c0_i32 = arith.constant 0 : i32
    %c0_i32_0 = arith.constant 0 : i32
    %c0_i32_1 = arith.constant 0 : i32
    return %c0_i32, %c0_i32_0 : i32, i32
  }
  func.func @transform_2(%arg0: i32) -> (i32, i32) {
    %c0_i32 = arith.constant 0 : i32
    %c0_i32_0 = arith.constant 0 : i32
    %c0_i32_1 = arith.constant 0 : i32
    return %c0_i32, %c0_i32_0 : i32, i32
  }
  func.func @transform_3(%arg0: i32) -> (i32, i32) {
    %c0_i32 = arith.constant 0 : i32
    %c0_i32_0 = arith.constant 0 : i32
    %c0_i32_1 = arith.constant 0 : i32
    return %c0_i32, %c0_i32_0 : i32, i32
  }
  func.func @transform_4(%arg0: i32) -> (i32, i32) {
    %c0_i32 = arith.constant 0 : i32
    %c0_i32_0 = arith.constant 0 : i32
    %c0_i32_1 = arith.constant 0 : i32
    return %c0_i32, %c0_i32_0 : i32, i32
  }
  func.func @transform_5(%arg0: i32) -> (i32, i32) {
    %c0_i32 = arith.constant 0 : i32
    %c0_i32_0 = arith.constant 0 : i32
    %c0_i32_1 = arith.constant 0 : i32
    return %c0_i32, %c0_i32_0 : i32, i32
  }
  func.func @transform_6(%arg0: i32) -> (i32, i32) {
    %c0_i32 = arith.constant 0 : i32
    %c0_i32_0 = arith.constant 0 : i32
    %c0_i32_1 = arith.constant 0 : i32
    return %c0_i32, %c0_i32_0 : i32, i32
  }
  func.func @transform_7(%arg0: i32) -> (i32, i32) {
    %c0_i32 = arith.constant 0 : i32
    %c0_i32_0 = arith.constant 0 : i32
    %c0_i32_1 = arith.constant 0 : i32
    return %c0_i32, %c0_i32_0 : i32, i32
  }
  func.func @transform_8(%arg0: i32) -> (i32, i32) {
    %c0_i32 = arith.constant 0 : i32
    %c0_i32_0 = arith.constant 0 : i32
    %c0_i32_1 = arith.constant 0 : i32
    return %c0_i32, %c0_i32_0 : i32, i32
  }
  func.func @transform_9(%arg0: i32) -> (i32, i32) {
    %c0_i32 = arith.constant 0 : i32
    %c0_i32_0 = arith.constant 0 : i32
    %c0_i32_1 = arith.constant 0 : i32
    return %c0_i32, %c0_i32_0 : i32, i32
  }
  func.func @transform_10(%arg0: i32) -> (i32, i32) {
    %c0_i32 = arith.constant 0 : i32
    %c0_i32_0 = arith.constant 0 : i32
    %c0_i32_1 = arith.constant 0 : i32
    return %c0_i32, %c0_i32_0 : i32, i32
  }
  func.func @transform_11(%arg0: i32) -> (i32, i32) {
    %c0_i32 = arith.constant 0 : i32
    %c0_i32_0 = arith.constant 0 : i32
    %c0_i32_1 = arith.constant 0 : i32
    return %c0_i32, %c0_i32_0 : i32, i32
  }
  func.func @transform_12(%arg0: i32) -> (i32, i32, i32) {
    %c0_i32 = arith.constant 0 : i32
    %c0_i32_0 = arith.constant 0 : i32
    %c0_i32_1 = arith.constant 0 : i32
    return %arg0, %c0_i32, %c0_i32_0 : i32, i32, i32
  }
}

</mosaic_0001>

<bundles_post_ra>
// kernel: tpu_custom_call.1
= control target key start
LH: loop header
LB: loop body
LE: loop exit
PB: predicated region body
PF: predicated region fallthrough
CT: control target
= control target key end

     0   :  { %s1992_s0 = inlined_call_operand.vmem [shape: f32[2,8,32], index: 0, kind: input, shape index: {}]   ;;  %s1993_s1 = inlined_call_operand.vmem [shape: f32[1,32], index: 1, kind: input, shape index: {}]   ;;  %s1994_s2 = inlined_call_operand.vmem [shape: f32[1,32], index: 2, kind: input, shape index: {}]   ;;  %s1995_s3 = inlined_call_operand.vmem [shape: bf16[32,96], index: 3, kind: input, shape index: {}]   ;;  %s1996_s4 = inlined_call_operand.vmem [shape: bf16[32,32], index: 4, kind: input, shape index: {}]   ;;  %s1997_s5 = inlined_call_operand.vmem [shape: f32[1,32], index: 5, kind: input, shape index: {}]   ;;  %s1998_s6 = inlined_call_operand.vmem [shape: f32[1,32], index: 6, kind: input, shape index: {}]   ;;  %s1999_s7 = inlined_call_operand.vmem [shape: f32[1,32], index: 7, kind: input, shape index: {}]   ;;  %s2000_s8 = inlined_call_operand.vmem [shape: bf16[32,128], index: 8, kind: input, shape index: {}]   ;;  %s2001_s9 = inlined_call_operand.vmem [shape: f32[1,128], index: 9, kind: input, shape index: {}]   ;;  %s2002_s10 = inlined_call_operand.vmem [shape: bf16[128,32], index: 10, kind: input, shape index: {}]   ;;  %s2003_s11 = inlined_call_operand.vmem [shape: f32[1,32], index: 11, kind: input, shape index: {}]   ;;  %s2004_s12 = inlined_call_operand.hbm [shape: f32[2,8,32], index: 12, kind: output, shape index: {}]  }
   0x1   :  { %2005 = sst [smem:[#allocation5_spill]] %s1992_s0 }
   0x2   :  { %2006 = sst [smem:[#allocation6_spill]] %s1993_s1 }
   0x3   :  { %17 = vsyncpa [#allocation3], 0 }
   0x4   :  { %19 = vsyncpa [#allocation3 + $0x1], 0  ;;  %s1723_s21 = smov 0   ;;  %s1725_s22 = smov 0  }
   0x5   :  { %s1727_s23 = smov 0   ;;  %s1729_s24 = smov 0  }
   0x6 LB: > { %s1744_s25 = sadd.s32 4294967295, %s1639_s24   ;;  %s1322_s26 = sadd.s32 4294967294, %s1639_s24   ;;  %s1639_s24 = sphi %s1729_s24, %s2014_s24   ;;  %s1635_s23 = sphi %s1727_s23, %s2013_s23   ;;  %s1631_s22 = sphi %s1725_s22, %s2012_s22   ;;  %s1627_s21 = sphi %s1723_s21, %s2011_s21  }
   0x7   : > { %s1748_s27 = sadd.s32 1, %s1639_s24   ;;  %s289_s28 = sadd.s32 1, %s1635_s23 }
   0x8   : > { %s286_s29 = ssub.s32 %s1639_s24, %s1748_s27  ;;  %p299_p0 = scmp.ne.s32.totalorder %s1635_s23, %s1631_s22 }
   0x9   : > { %p287_p1 = scmp.eq.s32.totalorder %s286_s29, 0  ;;  %p300_p2 = scmp.eq.s32.totalorder %s1744_s25, 1 }
   0xa   : > { %p305_p3 = scmp.ne.s32.totalorder %s1631_s22, %s1627_s21  ;;  %p306_p4 = scmp.eq.s32.totalorder %s1322_s26, 1 }
   0xb   : > { %s1759_s30 = scalar_select %p287_p1, %s1635_s23, %s289_s28  }
   0xc   : > { %p1761_p5 = por %p300_p2, %p299_p0  ;;  %p1765_p6 = por %p306_p4, %p305_p3 }
   0xd   : > { %p1325_p7 = scmp.ge.s32.totalorder %s1639_s24, 1  ;;  %p364_p8 = scmp.lt.s32.totalorder %s1639_s24, 3 }
   0xf   : > { %p365_p9 = pnand %p1325_p7, %p364_p8 }
  0x10   : > { %p405_p10 = scmp.lt.s32.totalorder (!%p365_p9), %s1744_s25, 1  ;;  %s2009_s0 = sld [smem:[#allocation5_spill]] (!%p365_p9) }
  0x11   : > { %368 = sbr.rel (%p365_p9) target bundleno = 2452 (0x994), region = 68  ;;  %s2010_s1 = sld [smem:[#allocation6_spill]] (!%p365_p9) }
  0x12   : > { %s1644_s20 = smov (!%p365_p9), 96   ;;  %s1645_s26 = smov (!%p365_p9), 88  }
  0x13   : > { %s1646_s28 = smov (!%p365_p9), 80   ;;  %s1647_s29 = smov (!%p365_p9), 112  }
  0x14   : > { %s1650_s17 = smov (!%p365_p9), 64   ;;  %s1651_s18 = smov (!%p365_p9), 56  }
  0x16   : > { %s406_s15 = scalar_select %p405_p10, %s1744_s25, 1  ;;  %vm413_vm0 = vcmask 261120   ;;  %v1545_v7 = vld [vmem:[%s1995_s3 + $0x8] sm:$0xff]   ;;  %v1641_v8 = vmov 0.0   ;;  %vm1642_vm1 = vmmov 0   ;;  %v1546_v9 = vld [vmem:[%s1995_s3] sm:$0xff]   ;;  %v503_v36 = vlaneseq }
  0x17   : > { %1398 = vmatprep.subr.bf16.mxu0 %v1641_v8  ;;  %1402 = vmatprep.mubr.msk.bf16.mxu0 %vm1642_vm1, %v1641_v8  ;;  %v1328_v14 = vld [vmem:[%s2010_s1] ss:$0 sm:$0xff]  ;;  %vm511_vm2 = vcmask 64512   ;;  %vm576_vm4 = vcmask 1043456   ;;  %vm966_vm5 = vcmask 130048   ;;  %vm968_vm6 = vcmask 195584  }
  0x18   : > { %s1327_s16 = sshll.u32 %s406_s15, 3  ;;  %1399 = vmatpush3.bf16.msra.mxu0 %v1545_v7  ;;  %1418 = vmatprep.subr.bf16.mxu1 %v1641_v8  ;;  %v1329_v16 = vld [vmem:[%s1994_s2] ss:$0 sm:$0xff]  ;;  %s1648_s15 = smov 72   ;;  %v504_v37 = vshrl.u32 %v503_v36, 7  ;;  %v506_v38 = vand.u32 127, %v503_v36 }
  0x19   : > { %s408_s19 = scalar_lea.vmem %s2009_s0, %s1327_s16  ;;  %1400 = vmatprep.subr.bf16.mxu0 %v1641_v8  ;;  %1420 = vmatprep.mubr.msk.bf16.mxu1 %vm1642_vm1, %v1641_v8  ;;  %s1649_s16 = smov 104  }
  0x1a   : > { %v1776_v0 = vld [vmem:[%s408_s19] sm:$0xff]  ;;  %s1643_s19 = smov 120   ;;  %vm507_vm3 = vcmp.ge.s32.totalorder %v504_v37, %v506_v38 }
  0x1b   : > { %v414_v1 = vsel %vm413_vm0, %v1776_v0, 0.0 }
  0x1c   : > { %415 = vadd.xlane.f32.xlu0 %v414_v1  ;;  %1401 = vmatpush3.bf16.msra.mxu0 %v1546_v9 }
  0x1d   : > { %1406 = vmatprep.subr.bf16.mxu0 %v1641_v8 }
  0xa5   : > { %v416_v2 = vpop.xlane.xlu0 %415 }
  0xa6   : > { %v418_v3 = vmul.f32 0.03125, %v416_v2 }
  0xa8   : > { %v419_v4 = vsub.f32 %v1776_v0, %v418_v3 }
  0xaa   : > { %v420_v5 = vmul.f32 %v419_v4, %v419_v4 }
  0xac   : > { %v421_v6 = vsel %vm413_vm0, %v420_v5, 0.0 }
  0xad   : > { %422 = vadd.xlane.f32.xlu0 %v421_v6 }
 0x136   : > { %v423_v10 = vpop.xlane.xlu0 %422 }
 0x137   : > { %v424_v11 = vmul.f32 0.03125, %v423_v10 }
 0x139   : > { %v425_v12 = vadd.f32 1e-05, %v424_v11 }
 0x13b   : > { %1559 = vrsqrt.f32 %v425_v12 }
 0x148   : > { %v1560_v13 = vpop.eup %1559 }
 0x149   : > { %v427_v15 = vmul.f32 %v1560_v13, %v419_v4 }
 0x14b   : > { %v434_v17 = vmul.f32 %v1328_v14, %v427_v15 }
 0x14d   : > { %v441_v18 = vadd.f32 %v1329_v16, %v434_v17 }
 0x14f   : > { %v442_v19 = vpack.c.bf16 %v441_v18, %v441_v18 }
 0x151   : > { %1403 = vmatmul.mubr.msk.bf16.vlgmr.msra.gmra.mxu0 %vm413_vm0, %v442_v19 }
 0x152   : > { %1408 = vmatprep.mubr.msk.bf16.mxu0 %vm1642_vm1, %v1641_v8 }
 0x211   : > { %v496_v20 = vpop.f32.mrf.mxu0 }
 0x212   : > { %v1805_v21 = vpack.c.bf16 %v496_v20, %v496_v20 }
 0x213   : > { %v1404_v22 = vpop.f32.mrf.mxu0 }
 0x214   : > { %620 = vrot.lane.b32.xlu0 %v1805_v21, %s1643_s19  ;;  %509 = vrot.lane.b32.xlu1 %v1805_v21, %s1644_s20  ;;  %s1652_s19 = smov 48   ;;  %s1653_s20 = smov 40  }
 0x215   : > { %v499_v23 = vpop.f32.mrf.mxu0 }
 0x217   : > { %v1405_v24 = vpop.f32.mrf.mxu0 }
 0x218   : > { %622 = vrot.lane.b32.xlu1 %v1805_v21, %s1645_s26  ;;  %s1654_s26 = smov 8  }
 0x21c   : > { %733 = vrot.lane.b32.xlu1 %v1805_v21, %s1646_s28  ;;  %s1657_s28 = smov [#allocation2]  }
 0x220   : > { %731 = vrot.lane.b32.xlu1 %v1805_v21, %s1647_s29  ;;  %s1583_s29 = sshll.u32 %s1657_s28, 4  ;;  %s1584_s29 = int_to_ptr.vmem [resolvable:$false] %s1583_s29 }
 0x224   : > { %844 = vrot.lane.b32.xlu1 %v1805_v21, %s1648_s15  ;;  %s1361_s15 = sshll.u32 %s1744_s25, 7 }
 0x225   : > { %s1950_s0 = scalar_lea.hbm %s2004_s12, %s1361_s15  ;;  %s1585_s15 = scalar_lea.vmem %s1584_s29, 256 }
 0x228   : > { %842 = vrot.lane.b32.xlu1 %v1805_v21, %s1649_s16 }
 0x286   : > { %v510_v25 = vpop.permute.xlu1 %509  ;;  %v621_v30 = vpop.permute.xlu0 %620 }
 0x287   : > { %v516_v26 = vsel %vm511_vm2, %v510_v25, 0 }
 0x288   : > { %1407 = vmatpush3.bf16.xpose.msra.mxu0 %v516_v26 }
 0x289   : > { %1412 = vmatprep.subr.bf16.mxu0 %v1641_v8 }
 0x28a   : > { %v623_v27 = vpop.permute.xlu1 %622 }
 0x28b   : > { %v628_v28 = vsel %vm511_vm2, %v623_v27, 0 }
 0x28c   : > { %1419 = vmatpush3.bf16.xpose.msra.mxu1 %v628_v28 }
 0x28d   : > { %1430 = vmatprep.subr.bf16.mxu1 %v1641_v8 }
 0x28e   : > { %v734_v29 = vpop.permute.xlu1 %733 }
 0x28f   : > { %1409 = vmatmul.mubr.msk.bf16.vlgmr.msra.gmra.mxu0 %vm511_vm2, %v1805_v21  ;;  %v739_v32 = vsel %vm511_vm2, %v734_v29, 0 }
 0x290   : > { %1414 = vmatprep.mubr.msk.bf16.mxu0 %vm1642_vm1, %v1641_v8 }
 0x292   : > { %v732_v31 = vpop.permute.xlu1 %731 }
 0x293   : > { %1421 = vmatmul.mubr.msk.bf16.vlgmr.msra.gmra.mxu1 %vm511_vm2, %v621_v30 }
 0x294   : > { %1431 = vmatpush3.bf16.xpose.msra.mxu1 %v739_v32  ;;  %1432 = vmatprep.mubr.msk.bf16.mxu1 %vm1642_vm1, %v1641_v8 }
 0x295   : > { %1442 = vmatprep.subr.bf16.mxu1 %v1641_v8 }
 0x296   : > { %v845_v33 = vpop.permute.xlu1 %844 }
 0x297   : > { %v850_v34 = vsel %vm511_vm2, %v845_v33, 0 }
 0x29a   : > { %v843_v35 = vpop.permute.xlu1 %842 }
 0x29b   : > { %1433 = vmatmul.mubr.msk.bf16.vlgmr.msra.gmra.mxu1 %vm511_vm2, %v732_v31 }
 0x29c   : > { %1443 = vmatpush3.bf16.xpose.msra.mxu1 %v850_v34  ;;  %1444 = vmatprep.mubr.msk.bf16.mxu1 %vm1642_vm1, %v1641_v8 }
 0x29d   : > { %1454 = vmatprep.subr.bf16.mxu1 %v1641_v8 }
 0x2a3   : > { %1445 = vmatmul.mubr.msk.bf16.vlgmr.msra.gmra.mxu1 %vm511_vm2, %v843_v35 }
 0x2a4   : > { %1458 = vmatprep.mubr.msk.bf16.mxu1 %vm1642_vm1, %v1641_v8 }
 0x34f   : > { %v552_v39 = vpop.f32.mrf.mxu0 }
 0x350   : > { %v558_v40 = vsel %vm507_vm3, %v552_v39, -1e+30 }
 0x351   : > { %v1410_v41 = vpop.f32.mrf.mxu0  ;;  %v559_v42 = vsel %vm511_vm2, %v558_v40, -inf }
 0x352   : > { %560 = vmax.xlane.f32.xlu1 %v559_v42 }
 0x353   : > { %v555_v43 = vpop.f32.mrf.mxu0  ;;  %v664_v44 = vpop.f32.mrf.mxu1 }
 0x354   : > { %v670_v45 = vsel %vm507_vm3, %v664_v44, -1e+30 }
 0x355   : > { %v1411_v46 = vpop.f32.mrf.mxu0  ;;  %v1422_v47 = vpop.f32.mrf.mxu1  ;;  %v671_v48 = vsel %vm511_vm2, %v670_v45, -inf }
 0x356   : > { %672 = vmax.xlane.f32.xlu0 %v671_v48 }
 0x357   : > { %v667_v49 = vpop.f32.mrf.mxu1 }
 0x359   : > { %v1423_v50 = vpop.f32.mrf.mxu1 }
 0x35b   : > { %v775_v51 = vpop.f32.mrf.mxu1 }
 0x35c   : > { %v781_v52 = vsel %vm507_vm3, %v775_v51, -1e+30 }
 0x35d   : > { %v1434_v53 = vpop.f32.mrf.mxu1  ;;  %v782_v54 = vsel %vm511_vm2, %v781_v52, -inf }
 0x35e   : > { %783 = vmax.xlane.f32.xlu1 %v782_v54  ;;  %v1547_v53 = vld [vmem:[%s1996_s4 + $0x8] sm:$0xff]   ;;  %v1548_v54 = vld [vmem:[%s1996_s4] sm:$0xff]  }
 0x35f   : > { %v778_v55 = vpop.f32.mrf.mxu1  ;;  %1455 = vmatpush3.bf16.msra.mxu1 %v1547_v53 }
 0x360   : > { %1456 = vmatprep.subr.bf16.mxu1 %v1641_v8 }
 0x361   : > { %v1435_v56 = vpop.f32.mrf.mxu1 }
 0x363   : > { %v886_v57 = vpop.f32.mrf.mxu1  ;;  %1457 = vmatpush3.bf16.msra.mxu1 %v1548_v54 }
 0x364   : > { %v892_v58 = vsel %vm507_vm3, %v886_v57, -1e+30  ;;  %1470 = vmatprep.subr.bf16.mxu1 %v1641_v8 }
 0x365   : > { %v1446_v59 = vpop.f32.mrf.mxu1  ;;  %v893_v60 = vsel %vm511_vm2, %v892_v58, -inf }
 0x366   : > { %894 = vmax.xlane.f32.xlu0 %v893_v60 }
 0x367   : > { %v889_v61 = vpop.f32.mrf.mxu1 }
 0x369   : > { %v1447_v62 = vpop.f32.mrf.mxu1 }
 0x3db   : > { %v561_v63 = vpop.xlane.xlu1 %560 }
 0x3dc   : > { %v562_v1 = vsub.f32 %v558_v40, %v561_v63 }
 0x3de   : > { %v563_v2 = vmul.f32 1.442695, %v562_v1 }
 0x3df   : > { %v673_v3 = vpop.xlane.xlu0 %672 }
 0x3e0   : > { %1561 = vpow2.f32 %v563_v2  ;;  %v674_v4 = vsub.f32 %v670_v45, %v673_v3 }
 0x3e2   : > { %v675_v5 = vmul.f32 1.442695, %v674_v4 }
 0x3e4   : > { %1563 = vpow2.f32 %v675_v5 }
 0x3e7   : > { %v784_v16 = vpop.xlane.xlu1 %783 }
 0x3e8   : > { %v785_v17 = vsub.f32 %v781_v52, %v784_v16 }
 0x3ea   : > { %v786_v18 = vmul.f32 1.442695, %v785_v17 }
 0x3ed   : > { %v1562_v6 = vpop.eup %1561 }
 0x3ee   : > { %v565_v7 = vsel %vm511_vm2, %v1562_v6, 0.0 }
 0x3ef   : > { %v895_v9 = vpop.xlane.xlu0 %894  ;;  %566 = vadd.xlane.f32.xlu1 %v565_v7  ;;  %v1341_v7 = vld [vmem:[%s1997_s5] ss:$0 sm:$0xff] }
 0x3f0   : > { %v896_v10 = vsub.f32 %v892_v58, %v895_v9 }
 0x3f1   : > { %v1564_v11 = vpop.eup %1563 }
 0x3f2   : > { %v897_v12 = vmul.f32 1.442695, %v896_v10  ;;  %v677_v13 = vsel %vm511_vm2, %v1564_v11, 0.0 }
 0x3f3   : > { %678 = vadd.xlane.f32.xlu0 %v677_v13 }
 0x3f4   : > { %1565 = vpow2.f32 %v897_v12 }
 0x3f5   : > { %1567 = vpow2.f32 %v786_v18 }
 0x400   : > { %571 = vrot.lane.b32.xlu1 %v1805_v21, %s1650_s17  ;;  %s1655_s17 = smov 16  }
 0x401   : > { %v1566_v14 = vpop.eup %1565 }
 0x402   : > { %v899_v15 = vsel %vm511_vm2, %v1566_v14, 0.0  ;;  %v1568_v19 = vpop.eup %1567 }
 0x403   : > { %900 = vadd.xlane.f32.xlu0 %v899_v15  ;;  %v788_v20 = vsel %vm511_vm2, %v1568_v19, 0.0 }
 0x419   : > { %683 = vrot.lane.b32.xlu0 %v1805_v21, %s1651_s18  ;;  %s1656_s18 = smov 24  }
 0x424   : > { %789 = vadd.xlane.f32.xlu1 %v788_v20 }
 0x435   : > { %794 = vrot.lane.b32.xlu1 %v1805_v21, %s1652_s19 }
 0x439   : > { %905 = vrot.lane.b32.xlu1 %v1805_v21, %s1653_s20  ;;  %s402_s20 = sand.u32 1, %s1631_s22  }
 0x43a   : > { %s1250_s25 = scalar_lea.sflag [#allocation3], %s402_s20 }
 0x478   : > { %v567_v22 = vpop.xlane.xlu1 %566 }
 0x479   : > { %1569 = vrcp.f32 %v567_v22  ;;  %v1549_v22 = vld [vmem:[%s2000_s8 + $0x8] sm:$0xff]  }
 0x47c   : > { %v679_v23 = vpop.xlane.xlu0 %678  ;;  %v572_v24 = vpop.permute.xlu1 %571 }
 0x47d   : > { %v578_v25 = vsel %vm576_vm4, %v572_v24, 0  ;;  %1571 = vrcp.f32 %v679_v23  ;;  %v1551_v23 = vld [vmem:[%s2002_s10 + $0x38] sm:$0xff]   ;;  %v1552_v24 = vld [vmem:[%s2002_s10 + $0x30] sm:$0xff]  }
 0x47e   : > { %1413 = vmatpush3.bf16.msra.mxu0 %v578_v25  ;;  %v1553_v25 = vld [vmem:[%s2002_s10 + $0x28] sm:$0xff]  }
 0x47f   : > { %1424 = vmatprep.subr.bf16.mxu0 %v1641_v8 }
 0x486   : > { %v1570_v26 = vpop.eup %1569 }
 0x487   : > { %v569_v27 = vmul.f32 %v1570_v26, %v1562_v6  ;;  %v1554_v26 = vld [vmem:[%s2002_s10 + $0x20] sm:$0xff]  }
 0x489   : > { %v570_v28 = vpack.c.bf16 %v569_v27, %v569_v27  ;;  %v1555_v27 = vld [vmem:[%s2002_s10 + $0x18] sm:$0xff]  }
 0x48a   : > { %v1572_v29 = vpop.eup %1571 }
 0x48b   : > { %1415 = vmatmul.mubr.msk.bf16.vlgmr.msra.gmra.mxu0 %vm511_vm2, %v570_v28  ;;  %v681_v21 = vmul.f32 %v1572_v29, %v1564_v11  ;;  %v1556_v28 = vld [vmem:[%s2002_s10 + $0x10] sm:$0xff]  }
 0x48c   : > { %v901_v30 = vpop.xlane.xlu0 %900  ;;  %1426 = vmatprep.mubr.msk.bf16.mxu0 %vm1642_vm1, %v1641_v8 }
 0x48d   : > { %v682_v33 = vpack.c.bf16 %v681_v21, %v681_v21 }
 0x490   : > { %v684_v31 = vpop.permute.xlu0 %683 }
 0x491   : > { %v689_v32 = vsel %vm576_vm4, %v684_v31, 0 }
 0x492   : > { %1425 = vmatpush3.bf16.msra.mxu0 %v689_v32  ;;  %v1345_v32 = vld [vmem:[%s1998_s6] ss:$0 sm:$0xff] }
 0x493   : > { %1436 = vmatprep.subr.bf16.mxu0 %v1641_v8 }
 0x495   : > { %1427 = vmatmul.mubr.msk.bf16.vlgmr.msra.gmra.mxu0 %vm511_vm2, %v682_v33 }
 0x496   : > { %1438 = vmatprep.mubr.msk.bf16.mxu0 %vm1642_vm1, %v1641_v8 }
 0x4ad   : > { %v790_v34 = vpop.xlane.xlu1 %789 }
 0x4ae   : > { %1573 = vrcp.f32 %v790_v34  ;;  %v1346_v34 = vld [vmem:[%s1999_s7] ss:$0 sm:$0xff] }
 0x4af   : > { %1575 = vrcp.f32 %v901_v30 }
 0x4b1   : > { %v795_v35 = vpop.permute.xlu1 %794 }
 0x4b2   : > { %v800_v36 = vsel %vm576_vm4, %v795_v35, 0 }
 0x4b3   : > { %1437 = vmatpush3.bf16.msra.mxu0 %v800_v36 }
 0x4b4   : > { %1448 = vmatprep.subr.bf16.mxu0 %v1641_v8 }
 0x4b5   : > { %v906_v39 = vpop.permute.xlu1 %905 }
 0x4b6   : > { %v911_v42 = vsel %vm576_vm4, %v906_v39, 0  ;;  %v1558_v39 = vld [vmem:[%s2002_s10] sm:$0xff]  }
 0x4bb   : > { %v1574_v37 = vpop.eup %1573 }
 0x4bc   : > { %v792_v38 = vmul.f32 %v1574_v37, %v1568_v19  ;;  %v1576_v41 = vpop.eup %1575 }
 0x4bd   : > { %v903_v43 = vmul.f32 %v1576_v41, %v1566_v14 }
 0x4be   : > { %v793_v40 = vpack.c.bf16 %v792_v38, %v792_v38  ;;  %v1557_v38 = vld [vmem:[%s2002_s10 + $0x8] sm:$0xff]  }
 0x4bf   : > { %v904_v44 = vpack.c.bf16 %v903_v43, %v903_v43 }
 0x4c0   : > { %1439 = vmatmul.mubr.msk.bf16.vlgmr.msra.gmra.mxu0 %vm511_vm2, %v793_v40  ;;  %v1347_v40 = vld [vmem:[%s2001_s9] ss:$0 sm:$0xff] }
 0x4c1   : > { %1449 = vmatpush3.bf16.msra.mxu0 %v911_v42  ;;  %1450 = vmatprep.mubr.msk.bf16.mxu0 %vm1642_vm1, %v1641_v8 }
 0x4c2   : > { %1462 = vmatprep.subr.bf16.mxu0 %v1641_v8 }
 0x4c8   : > { %1451 = vmatmul.mubr.msk.bf16.vlgmr.msra.gmra.mxu0 %vm511_vm2, %v904_v44 }
 0x4c9   : > { %1466 = vmatprep.mubr.msk.bf16.mxu0 %vm1642_vm1, %v1641_v8  ;;  %1463 = vmatpush3.bf16.msra.mxu0 %v1549_v22 }
 0x4ca   : > { %1464 = vmatprep.subr.bf16.mxu0 %v1641_v8 }
 0x54b   : > { %v614_v45 = vpop.f32.mrf.mxu0 }
 0x54d   : > { %v1416_v46 = vpop.f32.mrf.mxu0 }
 0x54f   : > { %v617_v47 = vpop.f32.mrf.mxu0 }
 0x551   : > { %v1417_v48 = vpop.f32.mrf.mxu0 }
 0x555   : > { %v725_v49 = vpop.f32.mrf.mxu0 }
 0x556   : > { %954 = vrot.lane.b32.xlu0 %v725_v49, %s1654_s26  ;;  %s1326_s26 = sshll.u32 %s402_s20, 3 }
 0x557   : > { %v1428_v50 = vpop.f32.mrf.mxu0  ;;  %s404_s16 = scalar_lea.vmem [#allocation2], %s1326_s26 }
 0x559   : > { %v728_v51 = vpop.f32.mrf.mxu0 }
 0x55b   : > { %v1429_v52 = vpop.f32.mrf.mxu0 }
 0x580   : > { %v836_v55 = vpop.f32.mrf.mxu0 }
 0x581   : > { %958 = vrot.lane.b32.xlu1 %v836_v55, %s1655_s17  ;;  %s1263_s17 = sshll.u32 %s404_s16, 4  ;;  %s1952_s17 = int_to_ptr.vmem [resolvable:$true] %s1263_s17 }
 0x582   : > { %v1440_v56 = vpop.f32.mrf.mxu0  ;;  %s1579_s26 = scalar_lea.vmem %s1952_s17, 128  ;;  %p1586_p0 = scmp.lt.s32.totalorder %s1952_s17, %s1584_s29 }
 0x583   : > { %p1580_p11 = scmp.ne.s32.totalorder %s1952_s17, %s1579_s26  ;;  %p1587_p1 = scmp.lt.s32.totalorder %s1585_s15, %s1579_s26 }
 0x584   : > { %v839_v57 = vpop.f32.mrf.mxu0 }
 0x585   : > { %p1581_p12 = pnand %p1580_p11, %p1761_p5  ;;  %p1588_p2 = por %p1587_p1, %p1586_p0 }
 0x586   : > { %v1441_v58 = vpop.f32.mrf.mxu0 }
 0x587   : > { %p1582_p13 = pneg %p1581_p12 }
 0x588   : > { %v947_v59 = vpop.f32.mrf.mxu0 }
 0x589   : > { %962 = vrot.lane.b32.xlu0 %v947_v59, %s1656_s18  ;;  %p1589_p3 = pnand %p1588_p2, %p1582_p13 }
 0x58a   : > { %v1452_v60 = vpop.f32.mrf.mxu0 }
 0x58c   : > { %v950_v61 = vpop.f32.mrf.mxu0 }
 0x58e   : > { %v1453_v62 = vpop.f32.mrf.mxu0 }
 0x5c8   : > { %v955_v63 = vpop.permute.xlu0 %954 }
 0x5c9   : > { %v965_v2 = vsel %vm511_vm2, %v614_v45, %v955_v63 }
 0x5f3   : > { %v959_v1 = vpop.permute.xlu1 %958 }
 0x5f4   : > { %v967_v3 = vsel %vm966_vm5, %v965_v2, %v959_v1 }
 0x5fb   : > { %v963_v4 = vpop.permute.xlu0 %962 }
 0x5fc   : > { %v969_v5 = vsel %vm968_vm6, %v967_v3, %v963_v4 }
 0x5fd   : > { %v970_v6 = vpack.c.bf16 %v969_v5, %v969_v5 }
 0x5ff   : > { %1459 = vmatmul.mubr.msk.bf16.vlgmr.msra.gmra.mxu1 %vm413_vm0, %v970_v6 }
 0x600   : > { %1486 = vmatprep.mubr.msk.bf16.mxu1 %vm1642_vm1, %v1641_v8  ;;  %1471 = vmatpush3.bf16.msra.mxu1 %v1551_v23 }
 0x601   : > { %1472 = vmatprep.subr.bf16.mxu1 %v1641_v8 }
 0x604   : > { %1473 = vmatpush3.bf16.msra.mxu1 %v1552_v24 }
 0x605   : > { %1474 = vmatprep.subr.bf16.mxu1 %v1641_v8 }
 0x608   : > { %1475 = vmatpush3.bf16.msra.mxu1 %v1553_v25 }
 0x609   : > { %1476 = vmatprep.subr.bf16.mxu1 %v1641_v8 }
 0x60c   : > { %1477 = vmatpush3.bf16.msra.mxu1 %v1554_v26 }
 0x60d   : > { %1478 = vmatprep.subr.bf16.mxu1 %v1641_v8 }
 0x610   : > { %1479 = vmatpush3.bf16.msra.mxu1 %v1555_v27 }
 0x611   : > { %1480 = vmatprep.subr.bf16.mxu1 %v1641_v8 }
 0x614   : > { %1481 = vmatpush3.bf16.msra.mxu1 %v1556_v28 }
 0x615   : > { %1482 = vmatprep.subr.bf16.mxu1 %v1641_v8 }
 0x618   : > { %1483 = vmatpush3.bf16.msra.mxu1 %v1557_v38 }
 0x619   : > { %1484 = vmatprep.subr.bf16.mxu1 %v1641_v8  ;;  %v1351_v8 = vld [vmem:[%s2003_s11] ss:$0 sm:$0xff] }
 0x61c   : > { %1485 = vmatpush3.bf16.msra.mxu1 %v1558_v39 }
 0x6bf   : > { %v1031_v9 = vpop.f32.mrf.mxu1 }
 0x6c0   : > { %v1032_v10 = vadd.f32 %v1341_v7, %v1031_v9 }
 0x6c1   : > { %v1460_v11 = vpop.f32.mrf.mxu1 }
 0x6c2   : > { %v1887_v12 = vadd.f32 %v1032_v10, %v1776_v0  ;;  %v1550_v0 = vld [vmem:[%s2000_s8] sm:$0xff]  }
 0x6c3   : > { %v1034_v13 = vpop.f32.mrf.mxu1  ;;  %1465 = vmatpush3.bf16.msra.mxu0 %v1550_v0 }
 0x6c4   : > { %v1040_v14 = vsel %vm413_vm0, %v1887_v12, 0.0 }
 0x6c5   : > { %1041 = vadd.xlane.f32.xlu1 %v1040_v14  ;;  %v1461_v15 = vpop.f32.mrf.mxu1 }
 0x74e   : > { %v1042_v16 = vpop.xlane.xlu1 %1041 }
 0x74f   : > { %v1043_v17 = vmul.f32 0.03125, %v1042_v16 }
 0x751   : > { %v1044_v18 = vsub.f32 %v1887_v12, %v1043_v17 }
 0x753   : > { %v1045_v19 = vmul.f32 %v1044_v18, %v1044_v18 }
 0x755   : > { %v1046_v20 = vsel %vm413_vm0, %v1045_v19, 0.0 }
 0x756   : > { %1047 = vadd.xlane.f32.xlu0 %v1046_v20 }
 0x7df   : > { %v1048_v29 = vpop.xlane.xlu0 %1047 }
 0x7e0   : > { %v1049_v30 = vmul.f32 0.03125, %v1048_v29 }
 0x7e2   : > { %v1050_v21 = vadd.f32 1e-05, %v1049_v30 }
 0x7e4   : > { %1577 = vrsqrt.f32 %v1050_v21 }
 0x7f1   : > { %v1578_v31 = vpop.eup %1577 }
 0x7f2   : > { %v1052_v33 = vmul.f32 %v1578_v31, %v1044_v18 }
 0x7f4   : > { %v1059_v35 = vmul.f32 %v1345_v32, %v1052_v33 }
 0x7f6   : > { %v1066_v36 = vadd.f32 %v1346_v34, %v1059_v35 }
 0x7f8   : > { %v1067_v37 = vpack.c.bf16 %v1066_v36, %v1066_v36 }
 0x7fa   : > { %1467 = vmatmul.mubr.msk.bf16.vlgmr.msra.gmra.mxu0 %vm413_vm0, %v1067_v37 }
 0x8ba   : > { %v1128_v41 = vpop.f32.mrf.mxu0 }
 0x8bb   : > { %v1129_v42 = vadd.f32 %v1347_v40, %v1128_v41 }
 0x8bc   : > { %v1468_v43 = vpop.f32.mrf.mxu0 }
 0x8bd   : > { %v1134_v44 = vmax.f32 %v1129_v42, 0.0 }
 0x8be   : > { %v1131_v45 = vpop.f32.mrf.mxu0 }
 0x8bf   : > { %v1135_v46 = vpack.c.bf16 %v1134_v44, %v1134_v44 }
 0x8c0   : > { %v1469_v47 = vpop.f32.mrf.mxu0 }
 0x8c1   : > { %1487 = vmatmul.mubr.bf16.vlgmr.msra.gmra.mxu1 %v1135_v46 }
 0x981   : > { %v1241_v48 = vpop.f32.mrf.mxu1 }
 0x982   : > { %v1242_v49 = vadd.f32 %v1351_v8, %v1241_v48 }
 0x983   : > { %v1488_v50 = vpop.f32.mrf.mxu1 }
 0x984   : > { %v1247_v51 = vadd.f32 %v1242_v49, %v1887_v12 }
 0x985   : > { %v1244_v52 = vpop.f32.mrf.mxu1 }
 0x986   : > { %1248 = vst.msk [vmem:[%s404_s16] sm:$0xff] %vm413_vm0, %v1247_v51 }
 0x987   : > { %v1489_v53 = vpop.f32.mrf.mxu1 }
 0x988   : > { %1592 = shalt.err (!%p1589_p3)
}
 0x989   : > { %s1593_s16 = scalar_lea.hbm %s1950_s0, 128  ;;  %s1597_s19 = scalar_lea.hbm %s2004_s12, 256 }
 0x98a   : > { %p1594_p4 = scmp.ne.s32.totalorder %s1950_s0, %s1593_s16  ;;  %p1598_p9 = scmp.lt.s32.totalorder %s1950_s0, %s2004_s12 }
 0x98b   : > { %p1599_p10 = scmp.lt.s32.totalorder %s1597_s19, %s1593_s16 }
 0x98c   : > { %p1595_p7 = pnand %p1594_p4, %p1761_p5 }
 0x98d   : > { %p1600_p11 = por %p1599_p10, %p1598_p9 }
 0x98e   : > { %p1596_p8 = pneg %p1595_p7 }
 0x990   : > { %p1601_p12 = pnand %p1600_p11, %p1596_p8 }
 0x992   : > { %1604 = shalt.err (!%p1601_p12)
}
 0x993   : > { %1490 = dma.vmem_to_hbm [thread:$0]  (%p1761_p5), %s1952_s17, 128, %s1950_s0, %s1250_s25  }
 0x994 PF: > { %p1496_p13 = scmp.ge.s32.totalorder %s1639_s24, 2  ;;  %s1275_s26 = sand.u32 1, %s1627_s21  }
 0x995   : > { %s1276_s1 = scalar_lea.sflag [#allocation3], %s1275_s26 }
 0x996   : > { %p1493_p0 = pnand %p1496_p13, %p1765_p6 }
 0x998   : > { %p1494_p1 = pneg %p1493_p0 }
 0x99a   : > { %1622 = dma.done.wait (%p1494_p1), %s1276_s1, 128  }
 0x99b   : > { %1624 = vsyncadd (%p1494_p1), %s1276_s1, 4294967168  ;;  %p22_p2 = scmp.ge.s32.totalorder %s1748_s27, 4   ;;  %s2011_s21 = smov %s1631_s22 }
 0x99c   : > { %s2012_s22 = smov %s1635_s23  ;;  %s2013_s23 = smov %s1759_s30 }
 0x99d   : > { %s2014_s24 = smov %s1748_s27  ;;  %24 = sbr.rel (!%p22_p2) target bundleno = 6 (0x6), region = 103 }
 0x9a2   :  { %1281 = vsyncpa [#allocation3], 1 }
 0x9a3   :  { %1283 = vsyncpa [#allocation3 + $0x1], 1 }

// kernel: tpu_custom_call.1
= control target key start
LH: loop header
LB: loop body
LE: loop exit
PB: predicated region body
PF: predicated region fallthrough
CT: control target
= control target key end

     0   :  { %s1992_s0 = inlined_call_operand.vmem [shape: f32[2,8,32], index: 0, kind: input, shape index: {}]   ;;  %s1993_s1 = inlined_call_operand.vmem [shape: f32[1,32], index: 1, kind: input, shape index: {}]   ;;  %s1994_s2 = inlined_call_operand.vmem [shape: f32[1,32], index: 2, kind: input, shape index: {}]   ;;  %s1995_s3 = inlined_call_operand.vmem [shape: bf16[32,96], index: 3, kind: input, shape index: {}]   ;;  %s1996_s4 = inlined_call_operand.vmem [shape: bf16[32,32], index: 4, kind: input, shape index: {}]   ;;  %s1997_s5 = inlined_call_operand.vmem [shape: f32[1,32], index: 5, kind: input, shape index: {}]   ;;  %s1998_s6 = inlined_call_operand.vmem [shape: f32[1,32], index: 6, kind: input, shape index: {}]   ;;  %s1999_s7 = inlined_call_operand.vmem [shape: f32[1,32], index: 7, kind: input, shape index: {}]   ;;  %s2000_s8 = inlined_call_operand.vmem [shape: bf16[32,128], index: 8, kind: input, shape index: {}]   ;;  %s2001_s9 = inlined_call_operand.vmem [shape: f32[1,128], index: 9, kind: input, shape index: {}]   ;;  %s2002_s10 = inlined_call_operand.vmem [shape: bf16[128,32], index: 10, kind: input, shape index: {}]   ;;  %s2003_s11 = inlined_call_operand.vmem [shape: f32[1,32], index: 11, kind: input, shape index: {}]   ;;  %s2004_s12 = inlined_call_operand.hbm [shape: f32[2,8,32], index: 12, kind: output, shape index: {}]  }
   0x1   :  { %2005 = sst [smem:[#allocation5_spill]] %s1992_s0 }
   0x2   :  { %2006 = sst [smem:[#allocation6_spill]] %s1993_s1 }
   0x3   :  { %17 = vsyncpa [#allocation3], 0 }
   0x4   :  { %19 = vsyncpa [#allocation3 + $0x1], 0  ;;  %s1723_s21 = smov 0   ;;  %s1725_s22 = smov 0  }
   0x5   :  { %s1727_s23 = smov 0   ;;  %s1729_s24 = smov 0  }
   0x6 LB: > { %s1744_s25 = sadd.s32 4294967295, %s1639_s24   ;;  %s1322_s26 = sadd.s32 4294967294, %s1639_s24   ;;  %s1639_s24 = sphi %s1729_s24, %s2014_s24   ;;  %s1635_s23 = sphi %s1727_s23, %s2013_s23   ;;  %s1631_s22 = sphi %s1725_s22, %s2012_s22   ;;  %s1627_s21 = sphi %s1723_s21, %s2011_s21  }
   0x7   : > { %s1748_s27 = sadd.s32 1, %s1639_s24   ;;  %s289_s28 = sadd.s32 1, %s1635_s23 }
   0x8   : > { %s286_s29 = ssub.s32 %s1639_s24, %s1748_s27  ;;  %p299_p0 = scmp.ne.s32.totalorder %s1635_s23, %s1631_s22 }
   0x9   : > { %p287_p1 = scmp.eq.s32.totalorder %s286_s29, 0  ;;  %p300_p2 = scmp.eq.s32.totalorder %s1744_s25, 1 }
   0xa   : > { %p305_p3 = scmp.ne.s32.totalorder %s1631_s22, %s1627_s21  ;;  %p306_p4 = scmp.eq.s32.totalorder %s1322_s26, 1 }
   0xb   : > { %s1759_s30 = scalar_select %p287_p1, %s1635_s23, %s289_s28  }
   0xc   : > { %p1761_p5 = por %p300_p2, %p299_p0  ;;  %p1765_p6 = por %p306_p4, %p305_p3 }
   0xd   : > { %p1325_p7 = scmp.ge.s32.totalorder %s1639_s24, 1  ;;  %p364_p8 = scmp.lt.s32.totalorder %s1639_s24, 3 }
   0xf   : > { %p365_p9 = pnand %p1325_p7, %p364_p8 }
  0x10   : > { %p405_p10 = scmp.lt.s32.totalorder (!%p365_p9), %s1744_s25, 1  ;;  %s2009_s0 = sld [smem:[#allocation5_spill]] (!%p365_p9) }
  0x11   : > { %368 = sbr.rel (%p365_p9) target bundleno = 2452 (0x994), region = 68  ;;  %s2010_s1 = sld [smem:[#allocation6_spill]] (!%p365_p9) }
  0x12   : > { %s1644_s20 = smov (!%p365_p9), 96   ;;  %s1645_s26 = smov (!%p365_p9), 88  }
  0x13   : > { %s1646_s28 = smov (!%p365_p9), 80   ;;  %s1647_s29 = smov (!%p365_p9), 112  }
  0x14   : > { %s1650_s17 = smov (!%p365_p9), 64   ;;  %s1651_s18 = smov (!%p365_p9), 56  }
  0x16   : > { %s406_s15 = scalar_select %p405_p10, %s1744_s25, 1  ;;  %vm413_vm0 = vcmask 261120   ;;  %v1545_v7 = vld [vmem:[%s1995_s3 + $0x8] sm:$0xff]   ;;  %v1641_v8 = vmov 0.0   ;;  %vm1642_vm1 = vmmov 0   ;;  %v1546_v9 = vld [vmem:[%s1995_s3] sm:$0xff]   ;;  %v503_v36 = vlaneseq }
  0x17   : > { %1398 = vmatprep.subr.bf16.mxu0 %v1641_v8  ;;  %1402 = vmatprep.mubr.msk.bf16.mxu0 %vm1642_vm1, %v1641_v8  ;;  %v1328_v14 = vld [vmem:[%s2010_s1] ss:$0 sm:$0xff]  ;;  %vm511_vm2 = vcmask 64512   ;;  %vm576_vm4 = vcmask 1043456   ;;  %vm966_vm5 = vcmask 130048   ;;  %vm968_vm6 = vcmask 195584  }
  0x18   : > { %s1327_s16 = sshll.u32 %s406_s15, 3  ;;  %1399 = vmatpush3.bf16.msra.mxu0 %v1545_v7  ;;  %1418 = vmatprep.subr.bf16.mxu1 %v1641_v8  ;;  %v1329_v16 = vld [vmem:[%s1994_s2] ss:$0 sm:$0xff]  ;;  %s1648_s15 = smov 72   ;;  %v504_v37 = vshrl.u32 %v503_v36, 7  ;;  %v506_v38 = vand.u32 127, %v503_v36 }
  0x19   : > { %s408_s19 = scalar_lea.vmem %s2009_s0, %s1327_s16  ;;  %1400 = vmatprep.subr.bf16.mxu0 %v1641_v8  ;;  %1420 = vmatprep.mubr.msk.bf16.mxu1 %vm1642_vm1, %v1641_v8  ;;  %s1649_s16 = smov 104  }
  0x1a   : > { %v1776_v0 = vld [vmem:[%s408_s19] sm:$0xff]  ;;  %s1643_s19 = smov 120   ;;  %vm507_vm3 = vcmp.ge.s32.totalorder %v504_v37, %v506_v38 }
  0x1b   : > { %v414_v1 = vsel %vm413_vm0, %v1776_v0, 0.0 }
  0x1c   : > { %415 = vadd.xlane.f32.xlu0 %v414_v1  ;;  %1401 = vmatpush3.bf16.msra.mxu0 %v1546_v9 }
  0x1d   : > { %1406 = vmatprep.subr.bf16.mxu0 %v1641_v8 }
  0xa5   : > { %v416_v2 = vpop.xlane.xlu0 %415 }
  0xa6   : > { %v418_v3 = vmul.f32 0.03125, %v416_v2 }
  0xa8   : > { %v419_v4 = vsub.f32 %v1776_v0, %v418_v3 }
  0xaa   : > { %v420_v5 = vmul.f32 %v419_v4, %v419_v4 }
  0xac   : > { %v421_v6 = vsel %vm413_vm0, %v420_v5, 0.0 }
  0xad   : > { %422 = vadd.xlane.f32.xlu0 %v421_v6 }
 0x136   : > { %v423_v10 = vpop.xlane.xlu0 %422 }
 0x137   : > { %v424_v11 = vmul.f32 0.03125, %v423_v10 }
 0x139   : > { %v425_v12 = vadd.f32 1e-05, %v424_v11 }
 0x13b   : > { %1559 = vrsqrt.f32 %v425_v12 }
 0x148   : > { %v1560_v13 = vpop.eup %1559 }
 0x149   : > { %v427_v15 = vmul.f32 %v1560_v13, %v419_v4 }
 0x14b   : > { %v434_v17 = vmul.f32 %v1328_v14, %v427_v15 }
 0x14d   : > { %v441_v18 = vadd.f32 %v1329_v16, %v434_v17 }
 0x14f   : > { %v442_v19 = vpack.c.bf16 %v441_v18, %v441_v18 }
 0x151   : > { %1403 = vmatmul.mubr.msk.bf16.vlgmr.msra.gmra.mxu0 %vm413_vm0, %v442_v19 }
 0x152   : > { %1408 = vmatprep.mubr.msk.bf16.mxu0 %vm1642_vm1, %v1641_v8 }
 0x211   : > { %v496_v20 = vpop.f32.mrf.mxu0 }
 0x212   : > { %v1805_v21 = vpack.c.bf16 %v496_v20, %v496_v20 }
 0x213   : > { %v1404_v22 = vpop.f32.mrf.mxu0 }
 0x214   : > { %620 = vrot.lane.b32.xlu0 %v1805_v21, %s1643_s19  ;;  %509 = vrot.lane.b32.xlu1 %v1805_v21, %s1644_s20  ;;  %s1652_s19 = smov 48   ;;  %s1653_s20 = smov 40  }
 0x215   : > { %v499_v23 = vpop.f32.mrf.mxu0 }
 0x217   : > { %v1405_v24 = vpop.f32.mrf.mxu0 }
 0x218   : > { %622 = vrot.lane.b32.xlu1 %v1805_v21, %s1645_s26  ;;  %s1654_s26 = smov 8  }
 0x21c   : > { %733 = vrot.lane.b32.xlu1 %v1805_v21, %s1646_s28  ;;  %s1657_s28 = smov [#allocation2]  }
 0x220   : > { %731 = vrot.lane.b32.xlu1 %v1805_v21, %s1647_s29  ;;  %s1583_s29 = sshll.u32 %s1657_s28, 4  ;;  %s1584_s29 = int_to_ptr.vmem [resolvable:$false] %s1583_s29 }
 0x224   : > { %844 = vrot.lane.b32.xlu1 %v1805_v21, %s1648_s15  ;;  %s1361_s15 = sshll.u32 %s1744_s25, 7 }
 0x225   : > { %s1950_s0 = scalar_lea.hbm %s2004_s12, %s1361_s15  ;;  %s1585_s15 = scalar_lea.vmem %s1584_s29, 256 }
 0x228   : > { %842 = vrot.lane.b32.xlu1 %v1805_v21, %s1649_s16 }
 0x286   : > { %v510_v25 = vpop.permute.xlu1 %509  ;;  %v621_v30 = vpop.permute.xlu0 %620 }
 0x287   : > { %v516_v26 = vsel %vm511_vm2, %v510_v25, 0 }
 0x288   : > { %1407 = vmatpush3.bf16.xpose.msra.mxu0 %v516_v26 }
 0x289   : > { %1412 = vmatprep.subr.bf16.mxu0 %v1641_v8 }
 0x28a   : > { %v623_v27 = vpop.permute.xlu1 %622 }
 0x28b   : > { %v628_v28 = vsel %vm511_vm2, %v623_v27, 0 }
 0x28c   : > { %1419 = vmatpush3.bf16.xpose.msra.mxu1 %v628_v28 }
 0x28d   : > { %1430 = vmatprep.subr.bf16.mxu1 %v1641_v8 }
 0x28e   : > { %v734_v29 = vpop.permute.xlu1 %733 }
 0x28f   : > { %1409 = vmatmul.mubr.msk.bf16.vlgmr.msra.gmra.mxu0 %vm511_vm2, %v1805_v21  ;;  %v739_v32 = vsel %vm511_vm2, %v734_v29, 0 }
 0x290   : > { %1414 = vmatprep.mubr.msk.bf16.mxu0 %vm1642_vm1, %v1641_v8 }
 0x292   : > { %v732_v31 = vpop.permute.xlu1 %731 }
 0x293   : > { %1421 = vmatmul.mubr.msk.bf16.vlgmr.msra.gmra.mxu1 %vm511_vm2, %v621_v30 }
 0x294   : > { %1431 = vmatpush3.bf16.xpose.msra.mxu1 %v739_v32  ;;  %1432 = vmatprep.mubr.msk.bf16.mxu1 %vm1642_vm1, %v1641_v8 }
 0x295   : > { %1442 = vmatprep.subr.bf16.mxu1 %v1641_v8 }
 0x296   : > { %v845_v33 = vpop.permute.xlu1 %844 }
 0x297   : > { %v850_v34 = vsel %vm511_vm2, %v845_v33, 0 }
 0x29a   : > { %v843_v35 = vpop.permute.xlu1 %842 }
 0x29b   : > { %1433 = vmatmul.mubr.msk.bf16.vlgmr.msra.gmra.mxu1 %vm511_vm2, %v732_v31 }
 0x29c   : > { %1443 = vmatpush3.bf16.xpose.msra.mxu1 %v850_v34  ;;  %1444 = vmatprep.mubr.msk.bf16.mxu1 %vm1642_vm1, %v1641_v8 }
 0x29d   : > { %1454 = vmatprep.subr.bf16.mxu1 %v1641_v8 }
 0x2a3   : > { %1445 = vmatmul.mubr.msk.bf16.vlgmr.msra.gmra.mxu1 %vm511_vm2, %v843_v35 }
 0x2a4   : > { %1458 = vmatprep.mubr.msk.bf16.mxu1 %vm1642_vm1, %v1641_v8 }
 0x34f   : > { %v552_v39 = vpop.f32.mrf.mxu0 }
 0x350   : > { %v558_v40 = vsel %vm507_vm3, %v552_v39, -1e+30 }
 0x351   : > { %v1410_v41 = vpop.f32.mrf.mxu0  ;;  %v559_v42 = vsel %vm511_vm2, %v558_v40, -inf }
 0x352   : > { %560 = vmax.xlane.f32.xlu1 %v559_v42 }
 0x353   : > { %v555_v43 = vpop.f32.mrf.mxu0  ;;  %v664_v44 = vpop.f32.mrf.mxu1 }
 0x354   : > { %v670_v45 = vsel %vm507_vm3, %v664_v44, -1e+30 }
 0x355   : > { %v1411_v46 = vpop.f32.mrf.mxu0  ;;  %v1422_v47 = vpop.f32.mrf.mxu1  ;;  %v671_v48 = vsel %vm511_vm2, %v670_v45, -inf }
 0x356   : > { %672 = vmax.xlane.f32.xlu0 %v671_v48 }
 0x357   : > { %v667_v49 = vpop.f32.mrf.mxu1 }
 0x359   : > { %v1423_v50 = vpop.f32.mrf.mxu1 }
 0x35b   : > { %v775_v51 = vpop.f32.mrf.mxu1 }
 0x35c   : > { %v781_v52 = vsel %vm507_vm3, %v775_v51, -1e+30 }
 0x35d   : > { %v1434_v53 = vpop.f32.mrf.mxu1  ;;  %v782_v54 = vsel %vm511_vm2, %v781_v52, -inf }
 0x35e   : > { %783 = vmax.xlane.f32.xlu1 %v782_v54  ;;  %v1547_v53 = vld [vmem:[%s1996_s4 + $0x8] sm:$0xff]   ;;  %v1548_v54 = vld [vmem:[%s1996_s4] sm:$0xff]  }
 0x35f   : > { %v778_v55 = vpop.f32.mrf.mxu1  ;;  %1455 = vmatpush3.bf16.msra.mxu1 %v1547_v53 }
 0x360   : > { %1456 = vmatprep.subr.bf16.mxu1 %v1641_v8 }
 0x361   : > { %v1435_v56 = vpop.f32.mrf.mxu1 }
 0x363   : > { %v886_v57 = vpop.f32.mrf.mxu1  ;;  %1457 = vmatpush3.bf16.msra.mxu1 %v1548_v54 }
 0x364   : > { %v892_v58 = vsel %vm507_vm3, %v886_v57, -1e+30  ;;  %1470 = vmatprep.subr.bf16.mxu1 %v1641_v8 }
 0x365   : > { %v1446_v59 = vpop.f32.mrf.mxu1  ;;  %v893_v60 = vsel %vm511_vm2, %v892_v58, -inf }
 0x366   : > { %894 = vmax.xlane.f32.xlu0 %v893_v60 }
 0x367   : > { %v889_v61 = vpop.f32.mrf.mxu1 }
 0x369   : > { %v1447_v62 = vpop.f32.mrf.mxu1 }
 0x3db   : > { %v561_v63 = vpop.xlane.xlu1 %560 }
 0x3dc   : > { %v562_v1 = vsub.f32 %v558_v40, %v561_v63 }
 0x3de   : > { %v563_v2 = vmul.f32 1.442695, %v562_v1 }
 0x3df   : > { %v673_v3 = vpop.xlane.xlu0 %672 }
 0x3e0   : > { %1561 = vpow2.f32 %v563_v2  ;;  %v674_v4 = vsub.f32 %v670_v45, %v673_v3 }
 0x3e2   : > { %v675_v5 = vmul.f32 1.442695, %v674_v4 }
 0x3e4   : > { %1563 = vpow2.f32 %v675_v5 }
 0x3e7   : > { %v784_v16 = vpop.xlane.xlu1 %783 }
 0x3e8   : > { %v785_v17 = vsub.f32 %v781_v52, %v784_v16 }
 0x3ea   : > { %v786_v18 = vmul.f32 1.442695, %v785_v17 }
 0x3ed   : > { %v1562_v6 = vpop.eup %1561 }
 0x3ee   : > { %v565_v7 = vsel %vm511_vm2, %v1562_v6, 0.0 }
 0x3ef   : > { %v895_v9 = vpop.xlane.xlu0 %894  ;;  %566 = vadd.xlane.f32.xlu1 %v565_v7  ;;  %v1341_v7 = vld [vmem:[%s1997_s5] ss:$0 sm:$0xff] }
 0x3f0   : > { %v896_v10 = vsub.f32 %v892_v58, %v895_v9 }
 0x3f1   : > { %v1564_v11 = vpop.eup %1563 }
 0x3f2   : > { %v897_v12 = vmul.f32 1.442695, %v896_v10  ;;  %v677_v13 = vsel %vm511_vm2, %v1564_v11, 0.0 }
 0x3f3   : > { %678 = vadd.xlane.f32.xlu0 %v677_v13 }
 0x3f4   : > { %1565 = vpow2.f32 %v897_v12 }
 0x3f5   : > { %1567 = vpow2.f32 %v786_v18 }
 0x400   : > { %571 = vrot.lane.b32.xlu1 %v1805_v21, %s1650_s17  ;;  %s1655_s17 = smov 16  }
 0x401   : > { %v1566_v14 = vpop.eup %1565 }
 0x402   : > { %v899_v15 = vsel %vm511_vm2, %v1566_v14, 0.0  ;;  %v1568_v19 = vpop.eup %1567 }
 0x403   : > { %900 = vadd.xlane.f32.xlu0 %v899_v15  ;;  %v788_v20 = vsel %vm511_vm2, %v1568_v19, 0.0 }
 0x419   : > { %683 = vrot.lane.b32.xlu0 %v1805_v21, %s1651_s18  ;;  %s1656_s18 = smov 24  }
 0x424   : > { %789 = vadd.xlane.f32.xlu1 %v788_v20 }
 0x435   : > { %794 = vrot.lane.b32.xlu1 %v1805_v21, %s1652_s19 }
 0x439   : > { %905 = vrot.lane.b32.xlu1 %v1805_v21, %s1653_s20  ;;  %s402_s20 = sand.u32 1, %s1631_s22  }
 0x43a   : > { %s1250_s25 = scalar_lea.sflag [#allocation3], %s402_s20 }
 0x478   : > { %v567_v22 = vpop.xlane.xlu1 %566 }
 0x479   : > { %1569 = vrcp.f32 %v567_v22  ;;  %v1549_v22 = vld [vmem:[%s2000_s8 + $0x8] sm:$0xff]  }
 0x47c   : > { %v679_v23 = vpop.xlane.xlu0 %678  ;;  %v572_v24 = vpop.permute.xlu1 %571 }
 0x47d   : > { %v578_v25 = vsel %vm576_vm4, %v572_v24, 0  ;;  %1571 = vrcp.f32 %v679_v23  ;;  %v1551_v23 = vld [vmem:[%s2002_s10 + $0x38] sm:$0xff]   ;;  %v1552_v24 = vld [vmem:[%s2002_s10 + $0x30] sm:$0xff]  }
 0x47e   : > { %1413 = vmatpush3.bf16.msra.mxu0 %v578_v25  ;;  %v1553_v25 = vld [vmem:[%s2002_s10 + $0x28] sm:$0xff]  }
 0x47f   : > { %1424 = vmatprep.subr.bf16.mxu0 %v1641_v8 }
 0x486   : > { %v1570_v26 = vpop.eup %1569 }
 0x487   : > { %v569_v27 = vmul.f32 %v1570_v26, %v1562_v6  ;;  %v1554_v26 = vld [vmem:[%s2002_s10 + $0x20] sm:$0xff]  }
 0x489   : > { %v570_v28 = vpack.c.bf16 %v569_v27, %v569_v27  ;;  %v1555_v27 = vld [vmem:[%s2002_s10 + $0x18] sm:$0xff]  }
 0x48a   : > { %v1572_v29 = vpop.eup %1571 }
 0x48b   : > { %1415 = vmatmul.mubr.msk.bf16.vlgmr.msra.gmra.mxu0 %vm511_vm2, %v570_v28  ;;  %v681_v21 = vmul.f32 %v1572_v29, %v1564_v11  ;;  %v1556_v28 = vld [vmem:[%s2002_s10 + $0x10] sm:$0xff]  }
 0x48c   : > { %v901_v30 = vpop.xlane.xlu0 %900  ;;  %1426 = vmatprep.mubr.msk.bf16.mxu0 %vm1642_vm1, %v1641_v8 }
 0x48d   : > { %v682_v33 = vpack.c.bf16 %v681_v21, %v681_v21 }
 0x490   : > { %v684_v31 = vpop.permute.xlu0 %683 }
 0x491   : > { %v689_v32 = vsel %vm576_vm4, %v684_v31, 0 }
 0x492   : > { %1425 = vmatpush3.bf16.msra.mxu0 %v689_v32  ;;  %v1345_v32 = vld [vmem:[%s1998_s6] ss:$0 sm:$0xff] }
 0x493   : > { %1436 = vmatprep.subr.bf16.mxu0 %v1641_v8 }
 0x495   : > { %1427 = vmatmul.mubr.msk.bf16.vlgmr.msra.gmra.mxu0 %vm511_vm2, %v682_v33 }
 0x496   : > { %1438 = vmatprep.mubr.msk.bf16.mxu0 %vm1642_vm1, %v1641_v8 }
 0x4ad   : > { %v790_v34 = vpop.xlane.xlu1 %789 }
 0x4ae   : > { %1573 = vrcp.f32 %v790_v34  ;;  %v1346_v34 = vld [vmem:[%s1999_s7] ss:$0 sm:$0xff] }
 0x4af   : > { %1575 = vrcp.f32 %v901_v30 }
 0x4b1   : > { %v795_v35 = vpop.permute.xlu1 %794 }
 0x4b2   : > { %v800_v36 = vsel %vm576_vm4, %v795_v35, 0 }
 0x4b3   : > { %1437 = vmatpush3.bf16.msra.mxu0 %v800_v36 }
 0x4b4   : > { %1448 = vmatprep.subr.bf16.mxu0 %v1641_v8 }
 0x4b5   : > { %v906_v39 = vpop.permute.xlu1 %905 }
 0x4b6   : > { %v911_v42 = vsel %vm576_vm4, %v906_v39, 0  ;;  %v1558_v39 = vld [vmem:[%s2002_s10] sm:$0xff]  }
 0x4bb   : > { %v1574_v37 = vpop.eup %1573 }
 0x4bc   : > { %v792_v38 = vmul.f32 %v1574_v37, %v1568_v19  ;;  %v1576_v41 = vpop.eup %1575 }
 0x4bd   : > { %v903_v43 = vmul.f32 %v1576_v41, %v1566_v14 }
 0x4be   : > { %v793_v40 = vpack.c.bf16 %v792_v38, %v792_v38  ;;  %v1557_v38 = vld [vmem:[%s2002_s10 + $0x8] sm:$0xff]  }
 0x4bf   : > { %v904_v44 = vpack.c.bf16 %v903_v43, %v903_v43 }
 0x4c0   : > { %1439 = vmatmul.mubr.msk.bf16.vlgmr.msra.gmra.mxu0 %vm511_vm2, %v793_v40  ;;  %v1347_v40 = vld [vmem:[%s2001_s9] ss:$0 sm:$0xff] }
 0x4c1   : > { %1449 = vmatpush3.bf16.msra.mxu0 %v911_v42  ;;  %1450 = vmatprep.mubr.msk.bf16.mxu0 %vm1642_vm1, %v1641_v8 }
 0x4c2   : > { %1462 = vmatprep.subr.bf16.mxu0 %v1641_v8 }
 0x4c8   : > { %1451 = vmatmul.mubr.msk.bf16.vlgmr.msra.gmra.mxu0 %vm511_vm2, %v904_v44 }
 0x4c9   : > { %1466 = vmatprep.mubr.msk.bf16.mxu0 %vm1642_vm1, %v1641_v8  ;;  %1463 = vmatpush3.bf16.msra.mxu0 %v1549_v22 }
 0x4ca   : > { %1464 = vmatprep.subr.bf16.mxu0 %v1641_v8 }
 0x54b   : > { %v614_v45 = vpop.f32.mrf.mxu0 }
 0x54d   : > { %v1416_v46 = vpop.f32.mrf.mxu0 }
 0x54f   : > { %v617_v47 = vpop.f32.mrf.mxu0 }
 0x551   : > { %v1417_v48 = vpop.f32.mrf.mxu0 }
 0x555   : > { %v725_v49 = vpop.f32.mrf.mxu0 }
 0x556   : > { %954 = vrot.lane.b32.xlu0 %v725_v49, %s1654_s26  ;;  %s1326_s26 = sshll.u32 %s402_s20, 3 }
 0x557   : > { %v1428_v50 = vpop.f32.mrf.mxu0  ;;  %s404_s16 = scalar_lea.vmem [#allocation2], %s1326_s26 }
 0x559   : > { %v728_v51 = vpop.f32.mrf.mxu0 }
 0x55b   : > { %v1429_v52 = vpop.f32.mrf.mxu0 }
 0x580   : > { %v836_v55 = vpop.f32.mrf.mxu0 }
 0x581   : > { %958 = vrot.lane.b32.xlu1 %v836_v55, %s1655_s17  ;;  %s1263_s17 = sshll.u32 %s404_s16, 4  ;;  %s1952_s17 = int_to_ptr.vmem [resolvable:$true] %s1263_s17 }
 0x582   : > { %v1440_v56 = vpop.f32.mrf.mxu0  ;;  %s1579_s26 = scalar_lea.vmem %s1952_s17, 128  ;;  %p1586_p0 = scmp.lt.s32.totalorder %s1952_s17, %s1584_s29 }
 0x583   : > { %p1580_p11 = scmp.ne.s32.totalorder %s1952_s17, %s1579_s26  ;;  %p1587_p1 = scmp.lt.s32.totalorder %s1585_s15, %s1579_s26 }
 0x584   : > { %v839_v57 = vpop.f32.mrf.mxu0 }
 0x585   : > { %p1581_p12 = pnand %p1580_p11, %p1761_p5  ;;  %p1588_p2 = por %p1587_p1, %p1586_p0 }
 0x586   : > { %v1441_v58 = vpop.f32.mrf.mxu0 }
 0x587   : > { %p1582_p13 = pneg %p1581_p12 }
 0x588   : > { %v947_v59 = vpop.f32.mrf.mxu0 }
 0x589   : > { %962 = vrot.lane.b32.xlu0 %v947_v59, %s1656_s18  ;;  %p1589_p3 = pnand %p1588_p2, %p1582_p13 }
 0x58a   : > { %v1452_v60 = vpop.f32.mrf.mxu0 }
 0x58c   : > { %v950_v61 = vpop.f32.mrf.mxu0 }
 0x58e   : > { %v1453_v62 = vpop.f32.mrf.mxu0 }
 0x5c8   : > { %v955_v63 = vpop.permute.xlu0 %954 }
 0x5c9   : > { %v965_v2 = vsel %vm511_vm2, %v614_v45, %v955_v63 }
 0x5f3   : > { %v959_v1 = vpop.permute.xlu1 %958 }
 0x5f4   : > { %v967_v3 = vsel %vm966_vm5, %v965_v2, %v959_v1 }
 0x5fb   : > { %v963_v4 = vpop.permute.xlu0 %962 }
 0x5fc   : > { %v969_v5 = vsel %vm968_vm6, %v967_v3, %v963_v4 }
 0x5fd   : > { %v970_v6 = vpack.c.bf16 %v969_v5, %v969_v5 }
 0x5ff   : > { %1459 = vmatmul.mubr.msk.bf16.vlgmr.msra.gmra.mxu1 %vm413_vm0, %v970_v6 }
 0x600   : > { %1486 = vmatprep.mubr.msk.bf16.mxu1 %vm1642_vm1, %v1641_v8  ;;  %1471 = vmatpush3.bf16.msra.mxu1 %v1551_v23 }
 0x601   : > { %1472 = vmatprep.subr.bf16.mxu1 %v1641_v8 }
 0x604   : > { %1473 = vmatpush3.bf16.msra.mxu1 %v1552_v24 }
 0x605   : > { %1474 = vmatprep.subr.bf16.mxu1 %v1641_v8 }
 0x608   : > { %1475 = vmatpush3.bf16.msra.mxu1 %v1553_v25 }
 0x609   : > { %1476 = vmatprep.subr.bf16.mxu1 %v1641_v8 }
 0x60c   : > { %1477 = vmatpush3.bf16.msra.mxu1 %v1554_v26 }
 0x60d   : > { %1478 = vmatprep.subr.bf16.mxu1 %v1641_v8 }
 0x610   : > { %1479 = vmatpush3.bf16.msra.mxu1 %v1555_v27 }
 0x611   : > { %1480 = vmatprep.subr.bf16.mxu1 %v1641_v8 }
 0x614   : > { %1481 = vmatpush3.bf16.msra.mxu1 %v1556_v28 }
 0x615   : > { %1482 = vmatprep.subr.bf16.mxu1 %v1641_v8 }
 0x618   : > { %1483 = vmatpush3.bf16.msra.mxu1 %v1557_v38 }
 0x619   : > { %1484 = vmatprep.subr.bf16.mxu1 %v1641_v8  ;;  %v1351_v8 = vld [vmem:[%s2003_s11] ss:$0 sm:$0xff] }
 0x61c   : > { %1485 = vmatpush3.bf16.msra.mxu1 %v1558_v39 }
 0x6bf   : > { %v1031_v9 = vpop.f32.mrf.mxu1 }
 0x6c0   : > { %v1032_v10 = vadd.f32 %v1341_v7, %v1031_v9 }
 0x6c1   : > { %v1460_v11 = vpop.f32.mrf.mxu1 }
 0x6c2   : > { %v1887_v12 = vadd.f32 %v1032_v10, %v1776_v0  ;;  %v1550_v0 = vld [vmem:[%s2000_s8] sm:$0xff]  }
 0x6c3   : > { %v1034_v13 = vpop.f32.mrf.mxu1  ;;  %1465 = vmatpush3.bf16.msra.mxu0 %v1550_v0 }
 0x6c4   : > { %v1040_v14 = vsel %vm413_vm0, %v1887_v12, 0.0 }
 0x6c5   : > { %1041 = vadd.xlane.f32.xlu1 %v1040_v14  ;;  %v1461_v15 = vpop.f32.mrf.mxu1 }
 0x74e   : > { %v1042_v16 = vpop.xlane.xlu1 %1041 }
 0x74f   : > { %v1043_v17 = vmul.f32 0.03125, %v1042_v16 }
 0x751   : > { %v1044_v18 = vsub.f32 %v1887_v12, %v1043_v17 }
 0x753   : > { %v1045_v19 = vmul.f32 %v1044_v18, %v1044_v18 }
 0x755   : > { %v1046_v20 = vsel %vm413_vm0, %v1045_v19, 0.0 }
 0x756   : > { %1047 = vadd.xlane.f32.xlu0 %v1046_v20 }
 0x7df   : > { %v1048_v29 = vpop.xlane.xlu0 %1047 }
 0x7e0   : > { %v1049_v30 = vmul.f32 0.03125, %v1048_v29 }
 0x7e2   : > { %v1050_v21 = vadd.f32 1e-05, %v1049_v30 }
 0x7e4   : > { %1577 = vrsqrt.f32 %v1050_v21 }
 0x7f1   : > { %v1578_v31 = vpop.eup %1577 }
 0x7f2   : > { %v1052_v33 = vmul.f32 %v1578_v31, %v1044_v18 }
 0x7f4   : > { %v1059_v35 = vmul.f32 %v1345_v32, %v1052_v33 }
 0x7f6   : > { %v1066_v36 = vadd.f32 %v1346_v34, %v1059_v35 }
 0x7f8   : > { %v1067_v37 = vpack.c.bf16 %v1066_v36, %v1066_v36 }
 0x7fa   : > { %1467 = vmatmul.mubr.msk.bf16.vlgmr.msra.gmra.mxu0 %vm413_vm0, %v1067_v37 }
 0x8ba   : > { %v1128_v41 = vpop.f32.mrf.mxu0 }
 0x8bb   : > { %v1129_v42 = vadd.f32 %v1347_v40, %v1128_v41 }
 0x8bc   : > { %v1468_v43 = vpop.f32.mrf.mxu0 }
 0x8bd   : > { %v1134_v44 = vmax.f32 %v1129_v42, 0.0 }
 0x8be   : > { %v1131_v45 = vpop.f32.mrf.mxu0 }
 0x8bf   : > { %v1135_v46 = vpack.c.bf16 %v1134_v44, %v1134_v44 }
 0x8c0   : > { %v1469_v47 = vpop.f32.mrf.mxu0 }
 0x8c1   : > { %1487 = vmatmul.mubr.bf16.vlgmr.msra.gmra.mxu1 %v1135_v46 }
 0x981   : > { %v1241_v48 = vpop.f32.mrf.mxu1 }
 0x982   : > { %v1242_v49 = vadd.f32 %v1351_v8, %v1241_v48 }
 0x983   : > { %v1488_v50 = vpop.f32.mrf.mxu1 }
 0x984   : > { %v1247_v51 = vadd.f32 %v1242_v49, %v1887_v12 }
 0x985   : > { %v1244_v52 = vpop.f32.mrf.mxu1 }
 0x986   : > { %1248 = vst.msk [vmem:[%s404_s16] sm:$0xff] %vm413_vm0, %v1247_v51 }
 0x987   : > { %v1489_v53 = vpop.f32.mrf.mxu1 }
 0x988   : > { %1592 = shalt.err (!%p1589_p3)
}
 0x989   : > { %s1593_s16 = scalar_lea.hbm %s1950_s0, 128  ;;  %s1597_s19 = scalar_lea.hbm %s2004_s12, 256 }
 0x98a   : > { %p1594_p4 = scmp.ne.s32.totalorder %s1950_s0, %s1593_s16  ;;  %p1598_p9 = scmp.lt.s32.totalorder %s1950_s0, %s2004_s12 }
 0x98b   : > { %p1599_p10 = scmp.lt.s32.totalorder %s1597_s19, %s1593_s16 }
 0x98c   : > { %p1595_p7 = pnand %p1594_p4, %p1761_p5 }
 0x98d   : > { %p1600_p11 = por %p1599_p10, %p1598_p9 }
 0x98e   : > { %p1596_p8 = pneg %p1595_p7 }
 0x990   : > { %p1601_p12 = pnand %p1600_p11, %p1596_p8 }
 0x992   : > { %1604 = shalt.err (!%p1601_p12)
}
 0x993   : > { %1490 = dma.vmem_to_hbm [thread:$0]  (%p1761_p5), %s1952_s17, 128, %s1950_s0, %s1250_s25  }
 0x994 PF: > { %p1496_p13 = scmp.ge.s32.totalorder %s1639_s24, 2  ;;  %s1275_s26 = sand.u32 1, %s1627_s21  }
 0x995   : > { %s1276_s1 = scalar_lea.sflag [#allocation3], %s1275_s26 }
 0x996   : > { %p1493_p0 = pnand %p1496_p13, %p1765_p6 }
 0x998   : > { %p1494_p1 = pneg %p1493_p0 }
 0x99a   : > { %1622 = dma.done.wait (%p1494_p1), %s1276_s1, 128  }
 0x99b   : > { %1624 = vsyncadd (%p1494_p1), %s1276_s1, 4294967168  ;;  %p22_p2 = scmp.ge.s32.totalorder %s1748_s27, 4   ;;  %s2011_s21 = smov %s1631_s22 }
 0x99c   : > { %s2012_s22 = smov %s1635_s23  ;;  %s2013_s23 = smov %s1759_s30 }
 0x99d   : > { %s2014_s24 = smov %s1748_s27  ;;  %24 = sbr.rel (!%p22_p2) target bundleno = 6 (0x6), region = 103 }
 0x9a2   :  { %1281 = vsyncpa [#allocation3], 1 }
 0x9a3   :  { %1283 = vsyncpa [#allocation3 + $0x1], 1 }

</bundles_post_ra>
